<compile_context>
chip_gen: v7x
topology: tpu7x:2x2x1
jax: 0.10.0
libtpu: 0.0.40
codegen_flags: <defaults>
</compile_context>

<pallas_src>
import functools

import numpy as np
import jax
import jax.numpy as jnp
from jax.experimental import pallas as pl
from jax.experimental.pallas import tpu as pltpu


_LANE = 128
_MIB = 1024 * 1024


def _round_up(a, m):
    return -(-a // m) * m


def _pad_last(a, target):
    pad = target - a.shape[-1]
    if pad == 0:
        return a
    return jnp.pad(a, [(0, 0)] * (a.ndim - 1) + [(0, pad)])


def _pad2(a, shape):
    if tuple(a.shape) == tuple(shape):
        return a
    return jnp.pad(a, [(0, t - s) for t, s in zip(shape, a.shape)])


def _vmem_budget_bytes():
    """Per-generation VMEM budget for tile sizing (v7x has only 64 MiB)."""
    cap = 64 * _MIB  # conservative fallback = v7x per-TensorCore VMEM
    try:
        info = pltpu.get_tpu_info()
        cap = int(getattr(info, "vmem_capacity_bytes", cap) or cap)
    except Exception:
        pass
    # ~40 MiB on v7x (64 MiB physical), ~80 MiB on v5e/v6e (128 MiB physical).
    return max(32 * _MIB, min(int(0.625 * cap), 96 * _MIB))


def _pick_row_tile(N, Hp, Ip, Op, block_n, in_itemsize, vmem_budget):
    """Largest row tile (multiple of 16) fitting the VMEM budget, >= 2 steps."""
    # Double-buffered input/output row blocks + single-copy f32 intermediates.
    per_row = 2 * (4 * Hp * in_itemsize + 4 * Op * 4)        # x+v in, xo+vo out
    per_row += (Hp + 3 * Op + Ip + 2 * Op) * 4               # vec1, vec2, h, out2
    per_row = int(per_row * 1.25)                            # compiler headroom
    w_bytes = 2 * ((Hp * Hp + Hp * Op + 2 * Hp * Ip + 2 * Ip * Op) * in_itemsize
                   + (Ip + 2 * Op) * 4)                      # double-buffered weights
    tn = max(16, (vmem_budget - w_bytes) // max(per_row, 1))
    tn = min(int(tn), int(block_n))
    tn = max(16, (tn // 16) * 16)                            # bf16 sublane packing
    if N > 16:
        # v7x has 2 TensorCores: keep >= 2 grid steps on the "parallel" axis.
        tn = min(tn, _round_up(-(-N // 2), 16))
    return tn


# ----------------------------------------------------------------------------
# Fused kernel: one grid step processes a tn-row tile of atoms.
# ----------------------------------------------------------------------------
def _geb_kernel(scalar_activation, Hp, Op,
                x_ref, v_ref,
                w1_ref, w2_ref, wu1x_ref, wu1v_ref, bu1_ref,
                wu2_ref, bu2_ref,
                xo_ref, vo_ref):
    f32 = jnp.float32
    mm = lambda a, b: jnp.dot(a, b, preferred_element_type=f32)

    w1 = w1_ref[...]                                   # (Hp, Hp)
    w2 = w2_ref[...]                                   # (Hp, Op)
    cdt = w1.dtype                                     # matmul operand dtype

    # vec1 = || v @ W1 ||_2 over the 3 components; vec2_d = v_d @ W2.
    # v block is (tn, 3*Hp); per-component slices are 128-aligned lane views.
    sq = None
    vec2 = []
    for d in range(3):                                 # static, fully unrolled
        vd = v_ref[:, pl.ds(d * Hp, Hp)]               # (tn, Hp)
        p = mm(vd, w1)                                 # f32 accumulate
        sq = p * p if sq is None else sq + p * p
        vec2.append(mm(vd, w2))                        # (tn, Op) f32
    vec1 = jnp.sqrt(sq)                                # (tn, Hp) f32

    # update_net[0]: concat([x, vec1]) folded into two matmuls (+ bias), SiLU.
    h = (mm(x_ref[...], wu1x_ref[...])
         + mm(vec1.astype(cdt), wu1v_ref[...])
         + bu1_ref[...])                               # (tn, Ip) f32
    h = h * jax.nn.sigmoid(h)                          # SiLU (EUP), f32

    # update_net[2]: one wide (Ip, 2*Op) matmul; split xs / vg by lane slice.
    out2 = mm(h.astype(cdt), wu2_ref[...]) + bu2_ref[...]   # (tn, 2*Op) f32
    xs = out2[:, :Op]
    vg = out2[:, Op:]
    if scalar_activation:
        xs = xs * jax.nn.sigmoid(xs)

    xo_ref[...] = xs.astype(xo_ref.dtype)              # lane-dense store
    for d in range(3):                                 # 128-aligned lane-dense stores
        vo_ref[:, pl.ds(d * Op, Op)] = (vec2[d] * vg).astype(vo_ref.dtype)


# ----------------------------------------------------------------------------
# Wrapper: weight re-layout (once), lane padding, row tiling, pallas_call.
# ----------------------------------------------------------------------------
def gated_equivariant_block(x, v, params, *, scalar_activation=False,
                            block_n=1024, compute_dtype=jnp.bfloat16):
    """x: (N, H), v: (N, 3, H).  params follow the PyTorch (out, in) layout."""
    N, H = x.shape
    assert v.shape == (N, 3, H)
    O = params["w2"].shape[0]
    I = params["wu1"].shape[0]

    # Lane-dense padded feature sizes (no-ops when already multiples of 128).
    Hp, Ip, Op = (_round_up(d, _LANE) for d in (H, I, O))
    cdt = jnp.dtype(compute_dtype)
    in_itemsize = cdt.itemsize

    # --- one-time parameter re-layout: (in, out), split halves, pad, cast ---
    w1 = _pad2(jnp.transpose(params["w1"]), (Hp, Hp)).astype(cdt)
    w2 = _pad2(jnp.transpose(params["w2"]), (Hp, Op)).astype(cdt)
    wu1_t = jnp.transpose(params["wu1"])                               # (2H, I)
    wu1x = _pad2(wu1_t[:H], (Hp, Ip)).astype(cdt)
    wu1v = _pad2(wu1_t[H:], (Hp, Ip)).astype(cdt)
    bu1 = _pad_last(params["bu1"].reshape(1, I), Ip).astype(jnp.float32)
    wu2_t = jnp.transpose(params["wu2"])                               # (I, 2O)
    wu2 = jnp.concatenate([_pad2(wu2_t[:, :O], (Ip, Op)),
                           _pad2(wu2_t[:, O:], (Ip, Op))], axis=1).astype(cdt)
    bu2 = jnp.concatenate([_pad_last(params["bu2"][:O].reshape(1, O), Op),
                           _pad_last(params["bu2"][O:].reshape(1, O), Op)],
                          axis=1).astype(jnp.float32)

    # --- inputs: no transposes, no row padding.  (N,3,H)->(N,3*Hp) is a free
    # reshape whenever H is already a multiple of 128. ---
    xp = _pad_last(x, Hp).astype(cdt)                                  # (N, Hp)
    vp = _pad_last(v, Hp).reshape(N, 3 * Hp).astype(cdt)               # (N, 3*Hp)

    # --- row tile sized against a per-generation VMEM budget, >= 2 grid steps ---
    vmem_budget = _vmem_budget_bytes()
    tn = _pick_row_tile(N, Hp, Ip, Op, block_n, in_itemsize, vmem_budget)
    grid = (pl.cdiv(N, tn),)          # ragged last block handled by Pallas

    def row_spec(width):
        return pl.BlockSpec((tn, width), lambda i: (i, 0))

    def const_spec(shape):
        return pl.BlockSpec(shape, lambda i: (0,) * len(shape))
    # NOTE: constant weight blocks keep the default double buffer
    # (pl.Buffered(1) skipped for compile-safety; footprint is tiny here).

    kernel = functools.partial(_geb_kernel, bool(scalar_activation), Hp, Op)
    xo, vo = pl.pallas_call(
        kernel,
        grid=grid,
        in_specs=[row_spec(Hp), row_spec(3 * Hp),
                  const_spec((Hp, Hp)), const_spec((Hp, Op)),
                  const_spec((Hp, Ip)), const_spec((Hp, Ip)), const_spec((1, Ip)),
                  const_spec((Ip, 2 * Op)), const_spec((1, 2 * Op))],
        out_specs=[row_spec(Op), row_spec(3 * Op)],
        out_shape=(jax.ShapeDtypeStruct((N, Op), jnp.float32),
                   jax.ShapeDtypeStruct((N, 3 * Op), jnp.float32)),
        compiler_params=pltpu.CompilerParams(
            dimension_semantics=("parallel",),
            vmem_limit_bytes=int(vmem_budget)),
    )(xp, vp, w1, w2, wu1x, wu1v, bu1, wu2, bu2)

    x_out = xo if Op == O else xo[:, :O]
    v_out = vo.reshape(N, 3, Op)
    if Op != O:
        v_out = v_out[..., :O]
    return x_out, v_out


# ----------------------------------------------------------------------------
# Pure-JAX reference (mirrors the PyTorch forward) for verification.
# ----------------------------------------------------------------------------
def reference_forward(x, v, params, scalar_activation=False):
    O = params["w2"].shape[0]
    vec1 = jnp.linalg.norm(v @ params["w1"].T, axis=-2)            # (N, H)
    vec2 = v @ params["w2"].T                                      # (N, 3, O)
    xc = jnp.concatenate([x, vec1], axis=-1)                       # (N, 2H)
    h = jax.nn.silu(xc @ params["wu1"].T + params["bu1"])          # (N, I)
    out = h @ params["wu2"].T + params["bu2"]                      # (N, 2O)
    xs, vg = out[:, :O], out[:, O:]
    v_out = vg[:, None, :] * vec2
    if scalar_activation:
        xs = jax.nn.silu(xs)
    return xs.astype(jnp.float32), v_out.astype(jnp.float32)


if __name__ == "__main__":
    # Small shapes consistent with the module: N atoms, hidden, out channels.
    # N = 70 deliberately does not divide the row tile -> exercises the ragged
    # final block (no HBM pad copies).
    N, H, O = 70, 32, 16
    I = H                       # intermediate_channels defaults to hidden_channels
    scalar_activation = True    # exercise the optional SiLU on the scalar branch

    key = jax.random.PRNGKey(0)
    kx, kv, k1, k2, k3, k4, k5, k6 = jax.random.split(key, 8)
    x = jax.random.normal(kx, (N, H), dtype=jnp.float32)
    v = jax.random.normal(kv, (N, 3, H), dtype=jnp.float32)

    def xavier(k, shape):
        fan_out, fan_in = shape
        lim = (6.0 / (fan_in + fan_out)) ** 0.5
        return jax.random.uniform(k, shape, jnp.float32, -lim, lim)

    params = {
        "w1":  xavier(k1, (H, H)),        # vec1_proj.weight   (out, in)
        "w2":  xavier(k2, (O, H)),        # vec2_proj.weight
        "wu1": xavier(k3, (I, 2 * H)),    # update_net[0].weight
        "bu1": 0.1 * jax.random.normal(k4, (I,), dtype=jnp.float32),
        "wu2": xavier(k5, (2 * O, I)),    # update_net[2].weight
        "bu2": 0.1 * jax.random.normal(k6, (2 * O,), dtype=jnp.float32),
    }

    x_expect, v_expect = reference_forward(x, v, params, scalar_activation)

    # 1) f32 compute path: tight check of the kernel semantics.
    x32, v32 = gated_equivariant_block(x, v, params,
                                       scalar_activation=scalar_activation,
                                       compute_dtype=jnp.float32)
    jax.block_until_ready((x32, v32))
    np.testing.assert_allclose(np.asarray(x32), np.asarray(x_expect),
                               rtol=2e-3, atol=2e-3)
    np.testing.assert_allclose(np.asarray(v32), np.asarray(v_expect),
                               rtol=2e-3, atol=2e-3)

    # 2) Default bf16 MXU path: looser tolerance accounts for bf16 rounding of
    #    the matmul operands across three chained linear layers.
    xbf, vbf = gated_equivariant_block(x, v, params,
                                       scalar_activation=scalar_activation)
    jax.block_until_ready((xbf, vbf))
    np.testing.assert_allclose(np.asarray(xbf), np.asarray(x_expect),
                               rtol=8e-2, atol=8e-2)
    np.testing.assert_allclose(np.asarray(vbf), np.asarray(v_expect),
                               rtol=8e-2, atol=8e-2)

    print("KERNEL_OK")
</pallas_src>

<mosaic_0001>
module attributes {stable_mosaic.version = 11 : i64} {
  func.func @_geb_kernel(%arg0: i32, %arg1: memref<48x128xf32, #tpu.memory_space<vmem>>, %arg2: memref<48x384xf32, #tpu.memory_space<vmem>>, %arg3: memref<128x128xf32, #tpu.memory_space<vmem>>, %arg4: memref<128x128xf32, #tpu.memory_space<vmem>>, %arg5: memref<128x128xf32, #tpu.memory_space<vmem>>, %arg6: memref<128x128xf32, #tpu.memory_space<vmem>>, %arg7: memref<1x128xf32, #tpu.memory_space<vmem>>, %arg8: memref<128x256xf32, #tpu.memory_space<vmem>>, %arg9: memref<1x256xf32, #tpu.memory_space<vmem>>, %arg10: memref<48x128xf32, #tpu.memory_space<vmem>>, %arg11: memref<48x384xf32, #tpu.memory_space<vmem>>) attributes {dimension_semantics = [#tpu.dimension_semantics<parallel>], iteration_bounds = array<i64: 2>, scalar_prefetch = 0 : i64, scratch_operands = 0 : i64, tpu.core_type = #tpu.core_type<tc>, window_params = [{transform_indices = @transform_0, window_bounds = array<i64: 48, 128>}, {transform_indices = @transform_1, window_bounds = array<i64: 48, 384>}, {pipeline_mode = #tpu.pipeline_mode<synchronous>, transform_indices = @transform_2, window_bounds = array<i64: 128, 128>}, {pipeline_mode = #tpu.pipeline_mode<synchronous>, transform_indices = @transform_3, window_bounds = array<i64: 128, 128>}, {pipeline_mode = #tpu.pipeline_mode<synchronous>, transform_indices = @transform_4, window_bounds = array<i64: 128, 128>}, {pipeline_mode = #tpu.pipeline_mode<synchronous>, transform_indices = @transform_5, window_bounds = array<i64: 128, 128>}, {pipeline_mode = #tpu.pipeline_mode<synchronous>, transform_indices = @transform_6, window_bounds = array<i64: 1, 128>}, {pipeline_mode = #tpu.pipeline_mode<synchronous>, transform_indices = @transform_7, window_bounds = array<i64: 128, 256>}, {pipeline_mode = #tpu.pipeline_mode<synchronous>, transform_indices = @transform_8, window_bounds = array<i64: 1, 256>}, {transform_indices = @transform_9, window_bounds = array<i64: 48, 128>}, {transform_indices = @transform_10, window_bounds = array<i64: 48, 384>}]} {
    %c0 = arith.constant 0 : index
    %c0_0 = arith.constant 0 : index
    %0 = vector.load %arg3[%c0, %c0_0] : memref<128x128xf32, #tpu.memory_space<vmem>>, vector<128x128xf32>
    %c0_1 = arith.constant 0 : index
    %c0_2 = arith.constant 0 : index
    %1 = vector.load %arg4[%c0_1, %c0_2] : memref<128x128xf32, #tpu.memory_space<vmem>>, vector<128x128xf32>
    %c0_3 = arith.constant 0 : index
    %c0_4 = arith.constant 0 : index
    %2 = vector.load %arg2[%c0_3, %c0_4] : memref<48x384xf32, #tpu.memory_space<vmem>>, vector<48x128xf32>
    %cst = arith.constant dense<0.000000e+00> : vector<48x128xf32>
    %3 = tpu.matmul %2, %0, %cst {dimension_numbers = #tpu.dot_dimension_numbers<[1], [0], [0], [1], [0, 0, 1, 1], [], []>} : vector<48x128xf32>, vector<128x128xf32>, vector<48x128xf32> -> vector<48x128xf32>
    %4 = arith.mulf %3, %3 : vector<48x128xf32>
    %cst_5 = arith.constant dense<0.000000e+00> : vector<48x128xf32>
    %5 = tpu.matmul %2, %1, %cst_5 {dimension_numbers = #tpu.dot_dimension_numbers<[1], [0], [0], [1], [0, 0, 1, 1], [], []>} : vector<48x128xf32>, vector<128x128xf32>, vector<48x128xf32> -> vector<48x128xf32>
    %c0_6 = arith.constant 0 : index
    %c128 = arith.constant 128 : index
    %6 = vector.load %arg2[%c0_6, %c128] : memref<48x384xf32, #tpu.memory_space<vmem>>, vector<48x128xf32>
    %cst_7 = arith.constant dense<0.000000e+00> : vector<48x128xf32>
    %7 = tpu.matmul %6, %0, %cst_7 {dimension_numbers = #tpu.dot_dimension_numbers<[1], [0], [0], [1], [0, 0, 1, 1], [], []>} : vector<48x128xf32>, vector<128x128xf32>, vector<48x128xf32> -> vector<48x128xf32>
    %8 = arith.mulf %7, %7 : vector<48x128xf32>
    %9 = arith.addf %4, %8 : vector<48x128xf32>
    %cst_8 = arith.constant dense<0.000000e+00> : vector<48x128xf32>
    %10 = tpu.matmul %6, %1, %cst_8 {dimension_numbers = #tpu.dot_dimension_numbers<[1], [0], [0], [1], [0, 0, 1, 1], [], []>} : vector<48x128xf32>, vector<128x128xf32>, vector<48x128xf32> -> vector<48x128xf32>
    %c0_9 = arith.constant 0 : index
    %c256 = arith.constant 256 : index
    %11 = vector.load %arg2[%c0_9, %c256] : memref<48x384xf32, #tpu.memory_space<vmem>>, vector<48x128xf32>
    %cst_10 = arith.constant dense<0.000000e+00> : vector<48x128xf32>
    %12 = tpu.matmul %11, %0, %cst_10 {dimension_numbers = #tpu.dot_dimension_numbers<[1], [0], [0], [1], [0, 0, 1, 1], [], []>} : vector<48x128xf32>, vector<128x128xf32>, vector<48x128xf32> -> vector<48x128xf32>
    %13 = arith.mulf %12, %12 : vector<48x128xf32>
    %14 = arith.addf %9, %13 : vector<48x128xf32>
    %cst_11 = arith.constant dense<0.000000e+00> : vector<48x128xf32>
    %15 = tpu.matmul %11, %1, %cst_11 {dimension_numbers = #tpu.dot_dimension_numbers<[1], [0], [0], [1], [0, 0, 1, 1], [], []>} : vector<48x128xf32>, vector<128x128xf32>, vector<48x128xf32> -> vector<48x128xf32>
    %16 = math.sqrt %14 : vector<48x128xf32>
    %c0_12 = arith.constant 0 : index
    %c0_13 = arith.constant 0 : index
    %17 = vector.load %arg1[%c0_12, %c0_13] : memref<48x128xf32, #tpu.memory_space<vmem>>, vector<48x128xf32>
    %c0_14 = arith.constant 0 : index
    %c0_15 = arith.constant 0 : index
    %18 = vector.load %arg5[%c0_14, %c0_15] : memref<128x128xf32, #tpu.memory_space<vmem>>, vector<128x128xf32>
    %cst_16 = arith.constant dense<0.000000e+00> : vector<48x128xf32>
    %19 = tpu.matmul %17, %18, %cst_16 {dimension_numbers = #tpu.dot_dimension_numbers<[1], [0], [0], [1], [0, 0, 1, 1], [], []>} : vector<48x128xf32>, vector<128x128xf32>, vector<48x128xf32> -> vector<48x128xf32>
    %c0_17 = arith.constant 0 : index
    %c0_18 = arith.constant 0 : index
    %20 = vector.load %arg6[%c0_17, %c0_18] : memref<128x128xf32, #tpu.memory_space<vmem>>, vector<128x128xf32>
    %cst_19 = arith.constant dense<0.000000e+00> : vector<48x128xf32>
    %21 = tpu.matmul %16, %20, %cst_19 {dimension_numbers = #tpu.dot_dimension_numbers<[1], [0], [0], [1], [0, 0, 1, 1], [], []>} : vector<48x128xf32>, vector<128x128xf32>, vector<48x128xf32> -> vector<48x128xf32>
    %22 = arith.addf %19, %21 : vector<48x128xf32>
    %c0_20 = arith.constant 0 : index
    %c0_21 = arith.constant 0 : index
    %23 = vector.load %arg7[%c0_20, %c0_21] : memref<1x128xf32, #tpu.memory_space<vmem>>, vector<1x128xf32>
    %24 = vector.broadcast %23 : vector<1x128xf32> to vector<48x128xf32>
    %25 = arith.addf %22, %24 : vector<48x128xf32>
    %26 = arith.negf %25 : vector<48x128xf32>
    %27 = math.exp %26 : vector<48x128xf32>
    %cst_22 = arith.constant 1.000000e+00 : f32
    %28 = vector.broadcast %cst_22 : f32 to vector<48x128xf32>
    %29 = arith.addf %28, %27 : vector<48x128xf32>
    %30 = arith.divf %28, %29 : vector<48x128xf32>
    %31 = arith.mulf %25, %30 : vector<48x128xf32>
    %c0_23 = arith.constant 0 : index
    %c0_24 = arith.constant 0 : index
    %32 = vector.load %arg8[%c0_23, %c0_24] : memref<128x256xf32, #tpu.memory_space<vmem>>, vector<128x256xf32>
    %cst_25 = arith.constant dense<0.000000e+00> : vector<48x256xf32>
    %33 = tpu.matmul %31, %32, %cst_25 {dimension_numbers = #tpu.dot_dimension_numbers<[1], [0], [0], [1], [0, 0, 1, 1], [], []>} : vector<48x128xf32>, vector<128x256xf32>, vector<48x256xf32> -> vector<48x256xf32>
    %c0_26 = arith.constant 0 : index
    %c0_27 = arith.constant 0 : index
    %34 = vector.load %arg9[%c0_26, %c0_27] : memref<1x256xf32, #tpu.memory_space<vmem>>, vector<1x256xf32>
    %35 = vector.broadcast %34 : vector<1x256xf32> to vector<48x256xf32>
    %36 = arith.addf %33, %35 : vector<48x256xf32>
    %37 = vector.extract_strided_slice %36 {offsets = [0, 0], sizes = [48, 128], strides = [1, 1]} : vector<48x256xf32> to vector<48x128xf32>
    %38 = vector.extract_strided_slice %36 {offsets = [0, 128], sizes = [48, 128], strides = [1, 1]} : vector<48x256xf32> to vector<48x128xf32>
    %39 = arith.negf %37 : vector<48x128xf32>
    %40 = math.exp %39 : vector<48x128xf32>
    %cst_28 = arith.constant 1.000000e+00 : f32
    %41 = vector.broadcast %cst_28 : f32 to vector<48x128xf32>
    %42 = arith.addf %41, %40 : vector<48x128xf32>
    %43 = arith.divf %41, %42 : vector<48x128xf32>
    %44 = arith.mulf %37, %43 : vector<48x128xf32>
    %c0_29 = arith.constant 0 : index
    %c0_30 = arith.constant 0 : index
    %45 = vector.load %arg10[%c0_29, %c0_30] : memref<48x128xf32, #tpu.memory_space<vmem>>, vector<48x128xf32>
    tpu.vector_store %arg10[%c0_29, %c0_30], %44 {strides = array<i32>} : memref<48x128xf32, #tpu.memory_space<vmem>>, vector<48x128xf32>,
    %46 = arith.mulf %5, %38 : vector<48x128xf32>
    %c0_31 = arith.constant 0 : index
    %c0_32 = arith.constant 0 : index
    %47 = vector.load %arg11[%c0_31, %c0_32] : memref<48x384xf32, #tpu.memory_space<vmem>>, vector<48x128xf32>
    tpu.vector_store %arg11[%c0_31, %c0_32], %46 {strides = array<i32>} : memref<48x384xf32, #tpu.memory_space<vmem>>, vector<48x128xf32>,
    %48 = arith.mulf %10, %38 : vector<48x128xf32>
    %c0_33 = arith.constant 0 : index
    %c128_34 = arith.constant 128 : index
    %49 = vector.load %arg11[%c0_33, %c128_34] : memref<48x384xf32, #tpu.memory_space<vmem>>, vector<48x128xf32>
    tpu.vector_store %arg11[%c0_33, %c128_34], %48 {strides = array<i32>} : memref<48x384xf32, #tpu.memory_space<vmem>>, vector<48x128xf32>,
    %50 = arith.mulf %15, %38 : vector<48x128xf32>
    %c0_35 = arith.constant 0 : index
    %c256_36 = arith.constant 256 : index
    %51 = vector.load %arg11[%c0_35, %c256_36] : memref<48x384xf32, #tpu.memory_space<vmem>>, vector<48x128xf32>
    tpu.vector_store %arg11[%c0_35, %c256_36], %50 {strides = array<i32>} : memref<48x384xf32, #tpu.memory_space<vmem>>, vector<48x128xf32>,
    return
  }
  func.func @transform_0(%arg0: i32) -> (i32, i32) {
    %c0_i32 = arith.constant 0 : i32
    %c0_i32_0 = arith.constant 0 : i32
    return %arg0, %c0_i32 : i32, i32
  }
  func.func @transform_1(%arg0: i32) -> (i32, i32) {
    %c0_i32 = arith.constant 0 : i32
    %c0_i32_0 = arith.constant 0 : i32
    return %arg0, %c0_i32 : i32, i32
  }
  func.func @transform_2(%arg0: i32) -> (i32, i32) {
    %c0_i32 = arith.constant 0 : i32
    %c0_i32_0 = arith.constant 0 : i32
    %c0_i32_1 = arith.constant 0 : i32
    return %c0_i32, %c0_i32_0 : i32, i32
  }
  func.func @transform_3(%arg0: i32) -> (i32, i32) {
    %c0_i32 = arith.constant 0 : i32
    %c0_i32_0 = arith.constant 0 : i32
    %c0_i32_1 = arith.constant 0 : i32
    return %c0_i32, %c0_i32_0 : i32, i32
  }
  func.func @transform_4(%arg0: i32) -> (i32, i32) {
    %c0_i32 = arith.constant 0 : i32
    %c0_i32_0 = arith.constant 0 : i32
    %c0_i32_1 = arith.constant 0 : i32
    return %c0_i32, %c0_i32_0 : i32, i32
  }
  func.func @transform_5(%arg0: i32) -> (i32, i32) {
    %c0_i32 = arith.constant 0 : i32
    %c0_i32_0 = arith.constant 0 : i32
    %c0_i32_1 = arith.constant 0 : i32
    return %c0_i32, %c0_i32_0 : i32, i32
  }
  func.func @transform_6(%arg0: i32) -> (i32, i32) {
    %c0_i32 = arith.constant 0 : i32
    %c0_i32_0 = arith.constant 0 : i32
    %c0_i32_1 = arith.constant 0 : i32
    return %c0_i32, %c0_i32_0 : i32, i32
  }
  func.func @transform_7(%arg0: i32) -> (i32, i32) {
    %c0_i32 = arith.constant 0 : i32
    %c0_i32_0 = arith.constant 0 : i32
    %c0_i32_1 = arith.constant 0 : i32
    return %c0_i32, %c0_i32_0 : i32, i32
  }
  func.func @transform_8(%arg0: i32) -> (i32, i32) {
    %c0_i32 = arith.constant 0 : i32
    %c0_i32_0 = arith.constant 0 : i32
    %c0_i32_1 = arith.constant 0 : i32
    return %c0_i32, %c0_i32_0 : i32, i32
  }
  func.func @transform_9(%arg0: i32) -> (i32, i32) {
    %c0_i32 = arith.constant 0 : i32
    %c0_i32_0 = arith.constant 0 : i32
    return %arg0, %c0_i32 : i32, i32
  }
  func.func @transform_10(%arg0: i32) -> (i32, i32) {
    %c0_i32 = arith.constant 0 : i32
    %c0_i32_0 = arith.constant 0 : i32
    return %arg0, %c0_i32 : i32, i32
  }
}

</mosaic_0001>

<bundles_post_ra>
// kernel: tpu_custom_call.1
= control target key start
LH: loop header
LB: loop body
LE: loop exit
PB: predicated region body
PF: predicated region fallthrough
CT: control target
= control target key end

     0   :  { %s4165_s0 = inlined_call_operand.hbm [shape: f32[70,128], index: 0, kind: input, shape index: {}]   ;;  %s4166_s1 = inlined_call_operand.hbm [shape: f32[70,384], index: 1, kind: input, shape index: {}]   ;;  %s4167_s2 = inlined_call_operand.hbm [shape: f32[128,128], index: 2, kind: input, shape index: {}]   ;;  %s4168_s3 = inlined_call_operand.hbm [shape: f32[128,128], index: 3, kind: input, shape index: {}]   ;;  %s4169_s4 = inlined_call_operand.hbm [shape: f32[128,128], index: 4, kind: input, shape index: {}]   ;;  %s4170_s5 = inlined_call_operand.hbm [shape: f32[128,128], index: 5, kind: input, shape index: {}]   ;;  %s4171_s6 = inlined_call_operand.vmem [shape: f32[1,128], index: 6, kind: input, shape index: {}]   ;;  %s4172_s7 = inlined_call_operand.hbm [shape: f32[128,256], index: 7, kind: input, shape index: {}]   ;;  %s4173_s8 = inlined_call_operand.vmem [shape: f32[1,256], index: 8, kind: input, shape index: {}]   ;;  %s4174_s9 = inlined_call_operand.hbm [shape: f32[70,128], index: 9, kind: output, shape index: {0}]   ;;  %s4175_s10 = inlined_call_operand.hbm [shape: f32[70,384], index: 10, kind: output, shape index: {1}]  }
   0x1   :  { %4186 = sst [smem:[#allocation29_spill]] %s4168_s3 }
   0x2   :  { %4187 = sst [smem:[#allocation30_spill]] %s4173_s8 }
   0x3   :  { %4188 = sst [smem:[#allocation31_spill]] %s4174_s9 }
   0x4   :  { %4189 = sst [smem:[#allocation32_spill]] %s4175_s10 }
   0x5   :  { %16 = vsyncpa [#allocation3], 0 }
   0x6   :  { %18 = vsyncpa [#allocation3 + $0x1], 0 }
   0x7   :  { %19 = vsyncpa [#allocation6], 0 }
   0x8   :  { %21 = vsyncpa [#allocation6 + $0x1], 0 }
   0x9   :  { %22 = vsyncpa [#allocation9], 0 }
   0xa   :  { %23 = vsyncpa [#allocation12], 0 }
   0xb   :  { %24 = vsyncpa [#allocation4], 0 }
   0xc   :  { %26 = vsyncpa [#allocation4 + $0x1], 0 }
   0xd   :  { %27 = vsyncpa [#allocation16], 0 }
   0xe   :  { %29 = vsyncpa [#allocation16 + $0x1], 0  ;;  %s3379_s13 = smov 0   ;;  %s3381_s14 = smov 0  }
   0xf   :  { %s3383_s15 = smov 0   ;;  %s3385_s16 = smov 0  }
  0x10 LB: > { %4190 = sst [smem:[#allocation24_spill]] %s3288_s13  ;;  %s3400_s17 = sadd.s32 4294967295, %s3300_s16   ;;  %s3300_s16 = sphi %s3385_s16, %s4224_s16   ;;  %s3296_s15 = sphi %s3383_s15, %s4228_s15   ;;  %s3292_s14 = sphi %s3381_s14, %s4227_s14   ;;  %s3288_s13 = sphi %s3379_s13, %s4226_s13  }
  0x11   : > { %s1965_s18 = sadd.s32 4294967294, %s3300_s16   ;;  %s3404_s19 = sadd.s32 1, %s3300_s16  }
  0x12   : > { %4191 = sst [smem:[#allocation25_spill]] %s3404_s19  ;;  %s42_s20 = sadd.s32 1, %s3296_s15 }
  0x13   : > { %s39_s21 = ssub.s32 %s3300_s16, %s3404_s19  ;;  %p49_p0 = scmp.ne.s32.totalorder %s3296_s15, %s3292_s14 }
  0x14   : > { %p40_p1 = scmp.eq.s32.totalorder %s39_s21, 0  ;;  %p50_p2 = scmp.eq.s32.totalorder %s3300_s16, 0 }
  0x15   : > { %p55_p3 = scmp.ne.s32.totalorder %s3292_s14, %s3288_s13  ;;  %p4179_p4 = scmp.eq.s32.totalorder %s3400_s17, 0 }
  0x16   : > { %s3416_s22 = scalar_select %p40_p1, %s3296_s15, %s42_s20  }
  0x17   : > { %p3418_p5 = por %p50_p2, %p49_p0  ;;  %p3424_p6 = por %p4179_p4, %p55_p3 }
  0x18   : > { %4192 = sst [smem:[#allocation26_spill]] %s3416_s22  ;;  %p252_p7 = scmp.eq.s32.totalorder %s3400_s17, 1 }
  0x19   : > { %s4193_s23 = scalar_select %p3418_p5, 1, 0 }
  0x1a   : > { %s4194_s24 = scalar_select %p3424_p6, 1, 0 }
  0x1b   : > { %p258_p8 = scmp.eq.s32.totalorder %s1965_s18, 1  ;;  %p1966_p9 = scmp.ge.s32.totalorder %s3300_s16, 1 }
  0x1c   : > { %p291_p10 = scmp.lt.s32.totalorder %s3300_s16, 3  ;;  %p3431_p11 = por %p252_p7, %p49_p0 }
  0x1d   : > { %p3435_p12 = por %p258_p8, %p55_p3  ;;  %s3302_s28 = smov [#allocation8]  }
  0x1e   : > { %s4195_s25 = scalar_select %p3431_p11, 1, 0 }
  0x1f   : > { %s4197_s26 = scalar_select %p3435_p12, 1, 0 }
  0x20   : > { %4196 = sst [smem:[#allocation27_spill]] %s4195_s25  ;;  %p3439_p13 = pnand %p1966_p9, %p291_p10 }
  0x21   : > { %4198 = sst [smem:[#allocation28_spill]] %s4197_s26  ;;  %s316_s29 = sshll.u32 %s3302_s28, 4  ;;  %s317_s29 = int_to_ptr.vmem [resolvable:$true] %s316_s29 }
  0x22   : > { %s4199_s27 = scalar_select %p3439_p13, 1, 0 }
  0x23   : > { %p2844_p1 = pneg %p3439_p13  ;;  %s3303_s11 = smov [#allocation11]  }
  0x24   : > { %s342_s12 = sshll.u32 %s3303_s11, 4  ;;  %s4201_s3 = sld [smem:[#allocation29_spill]]  ;;  %s3451_s12 = int_to_ptr.vmem [resolvable:$true] %s342_s12 }
  0x25   : > { %p3447_p2 = pnand %p2844_p1, %p4179_p4 }
  0x27   : > { %p3461_p3 = pneg %p3447_p2 }
  0x2a   : > { %s2990_s21 = scalar_lea.hbm %s4201_s3, 2048 }
  0x2b   : > { %p2991_p0 = scmp.ne.s32.totalorder %s4201_s3, %s2990_s21  ;;  %p2997_p9 = scmp.lt.u32.totalorder %s2990_s21, %s4201_s3 }
  0x2d   : > { %p2993_p7 = pnand %p3461_p3, %p2991_p0 }
  0x2f   : > { %p2994_p8 = pneg %p2993_p7 }
  0x31   : > { %p2999_p10 = pnand %p2997_p9, %p2994_p8 }
  0x33   : > { %3002 = shalt.err (!%p2999_p10)
}
  0x34   : > { %s3003_s18 = scalar_lea.vmem %s317_s29, 2048  ;;  %p3011_p11 = scmp.lt.s32.totalorder %s317_s29, %s317_s29 }
  0x35   : > { %p3004_p1 = scmp.ne.s32.totalorder %s317_s29, %s3003_s18  ;;  %p3012_p6 = scmp.lt.s32.totalorder %s3003_s18, %s3003_s18 }
  0x37   : > { %p3006_p4 = pnand %p3004_p1, %p3461_p3  ;;  %p3013_p13 = por %p3012_p6, %p3011_p11 }
  0x39   : > { %p3007_p12 = pneg %p3006_p4 }
  0x3b   : > { %p3014_p5 = pnand %p3013_p13, %p3007_p12 }
  0x3d   : > { %3017 = shalt.err (!%p3014_p5)
}
  0x3e   : > { %s3304_s19 = smov 128   ;;  %s3305_s22 = smov 8  }
  0x3f   : > { %2850 = dma.hbm_to_vmem [thread:$0]  (!%p3447_p2), %s4201_s3, 2048, %s317_s29, [#allocation9], %s3304_s19, %s3304_s19, %s3305_s22  }
  0x40   : > { %s3018_s13 = scalar_lea.hbm %s4170_s5, 2048 }
  0x41   : > { %p3019_p4 = scmp.ne.s32.totalorder %s4170_s5, %s3018_s13  ;;  %p3025_p11 = scmp.lt.u32.totalorder %s3018_s13, %s4170_s5 }
  0x43   : > { %p3021_p5 = pnand %p3019_p4, %p3461_p3 }
  0x45   : > { %p3022_p6 = pneg %p3021_p5 }
  0x47   : > { %p3027_p12 = pnand %p3025_p11, %p3022_p6 }
  0x49   : > { %3030 = shalt.err (!%p3027_p12)
}
  0x4a   : > { %s3031_s29 = scalar_lea.vmem %s3451_s12, 2048  ;;  %p3039_p8 = scmp.lt.s32.totalorder %s3451_s12, %s3451_s12 }
  0x4b   : > { %p3032_p13 = scmp.ne.s32.totalorder %s3451_s12, %s3031_s29  ;;  %p3040_p9 = scmp.lt.s32.totalorder %s3031_s29, %s3031_s29 }
  0x4d   : > { %p3034_p0 = pnand %p3032_p13, %p3461_p3  ;;  %p3041_p10 = por %p3040_p9, %p3039_p8 }
  0x4f   : > { %p3035_p7 = pneg %p3034_p0 }
  0x51   : > { %p3042_p1 = pnand %p3041_p10, %p3035_p7 }
  0x53   : > { %3045 = shalt.err (!%p3042_p1)
}
  0x54   : > { %2856 = dma.hbm_to_vmem [thread:$0]  (!%p3447_p2), %s4170_s5, 2048, %s3451_s12, [#allocation12], %s3304_s19, %s3304_s19, %s3305_s22  }
  0x55   : > { %s3306_s13 = smov [#allocation7]   ;;  %s3307_s26 = smov [#allocation10]  }
  0x56   : > { %s303_s25 = sshll.u32 %s3306_s13, 4  ;;  %s329_s20 = sshll.u32 %s3307_s26, 4  ;;  %s304_s25 = int_to_ptr.vmem [resolvable:$true] %s303_s25  ;;  %s330_s20 = int_to_ptr.vmem [resolvable:$true] %s329_s20 }
  0x57   : > { %s3046_s18 = scalar_lea.hbm %s4167_s2, 2048 }
  0x58   : > { %p3047_p4 = scmp.ne.s32.totalorder %s4167_s2, %s3046_s18  ;;  %p3053_p11 = scmp.lt.u32.totalorder %s3046_s18, %s4167_s2 }
  0x5a   : > { %p3049_p5 = pnand %p3047_p4, %p3461_p3 }
  0x5c   : > { %p3050_p6 = pneg %p3049_p5 }
  0x5e   : > { %p3055_p12 = pnand %p3053_p11, %p3050_p6 }
  0x60   : > { %3058 = shalt.err (!%p3055_p12)
}
  0x61   : > { %s3059_s12 = scalar_lea.vmem %s304_s25, 2048  ;;  %p3067_p8 = scmp.lt.s32.totalorder %s304_s25, %s304_s25 }
  0x62   : > { %p3060_p13 = scmp.ne.s32.totalorder %s304_s25, %s3059_s12  ;;  %p3068_p9 = scmp.lt.s32.totalorder %s3059_s12, %s3059_s12 }
  0x64   : > { %p3062_p0 = pnand %p3060_p13, %p3461_p3  ;;  %p3069_p10 = por %p3068_p9, %p3067_p8 }
  0x66   : > { %p3063_p7 = pneg %p3062_p0 }
  0x68   : > { %p3070_p1 = pnand %p3069_p10, %p3063_p7 }
  0x6a   : > { %3073 = shalt.err (!%p3070_p1)
}
  0x6b   : > { %2847 = dma.hbm_to_vmem [thread:$0]  (!%p3447_p2), %s4167_s2, 2048, %s304_s25, [#allocation6], %s3304_s19, %s3304_s19, %s3305_s22  }
  0x6c   : > { %s3074_s26 = scalar_lea.hbm %s4169_s4, 2048 }
  0x6d   : > { %p3075_p4 = scmp.ne.s32.totalorder %s4169_s4, %s3074_s26  ;;  %p3081_p11 = scmp.lt.u32.totalorder %s3074_s26, %s4169_s4 }
  0x6f   : > { %p3077_p5 = pnand %p3075_p4, %p3461_p3 }
  0x71   : > { %p3078_p6 = pneg %p3077_p5 }
  0x73   : > { %p3083_p12 = pnand %p3081_p11, %p3078_p6 }
  0x75   : > { %3086 = shalt.err (!%p3083_p12)
}
  0x76   : > { %s3087_s9 = scalar_lea.vmem %s330_s20, 2048  ;;  %p3095_p8 = scmp.lt.s32.totalorder %s330_s20, %s330_s20 }
  0x77   : > { %p3088_p13 = scmp.ne.s32.totalorder %s330_s20, %s3087_s9  ;;  %p3096_p9 = scmp.lt.s32.totalorder %s3087_s9, %s3087_s9 }
  0x79   : > { %p3090_p0 = pnand %p3088_p13, %p3461_p3  ;;  %p3097_p10 = por %p3096_p9, %p3095_p8 }
  0x7b   : > { %p3091_p7 = pneg %p3090_p0 }
  0x7d   : > { %p3098_p1 = pnand %p3097_p10, %p3091_p7 }
  0x7f   : > { %3101 = shalt.err (!%p3098_p1)
}
  0x80   : > { %2853 = dma.hbm_to_vmem [thread:$0]  (!%p3447_p2), %s4169_s4, 2048, %s330_s20, [#allocation9], %s3304_s19, %s3304_s19, %s3305_s22  }
  0x81   : > { %s3308_s3 = smov [#allocation13]   ;;  %s3102_s26 = scalar_lea.hbm %s4172_s7, 4096 }
  0x82   : > { %s358_s8 = sshll.u32 %s3308_s3, 4  ;;  %p3103_p4 = scmp.ne.s32.totalorder %s4172_s7, %s3102_s26  ;;  %s359_s8 = int_to_ptr.vmem [resolvable:$true] %s358_s8 }
  0x83   : > { %p3109_p11 = scmp.lt.u32.totalorder %s3102_s26, %s4172_s7 }
  0x84   : > { %p3105_p5 = pnand %p3103_p4, %p3461_p3 }
  0x86   : > { %p3106_p6 = pneg %p3105_p5 }
  0x88   : > { %p3111_p12 = pnand %p3109_p11, %p3106_p6 }
  0x8a   : > { %3114 = shalt.err (!%p3111_p12)
}
  0x8b   : > { %s3115_s19 = scalar_lea.vmem %s359_s8, 4096  ;;  %p3123_p8 = scmp.lt.s32.totalorder %s359_s8, %s359_s8 }
  0x8c   : > { %p3116_p13 = scmp.ne.s32.totalorder %s359_s8, %s3115_s19  ;;  %p3124_p9 = scmp.lt.s32.totalorder %s3115_s19, %s3115_s19 }
  0x8e   : > { %p3118_p0 = pnand %p3116_p13, %p3461_p3  ;;  %p3125_p10 = por %p3124_p9, %p3123_p8 }
  0x90   : > { %p3119_p7 = pneg %p3118_p0 }
  0x92   : > { %p3126_p1 = pnand %p3125_p10, %p3119_p7 }
  0x94   : > { %3129 = shalt.err (!%p3126_p1)
}
  0x95   : > { %s3309_s22 = smov 256   ;;  %s3310_s20 = smov 16  }
  0x96   : > { %2859 = dma.hbm_to_vmem [thread:$0]  (!%p3447_p2), %s4172_s7, 4096, %s359_s8, [#allocation12], %s3309_s22, %s3309_s22, %s3310_s20  }
  0x97   : > { %p1972_p4 = scmp.ge.s32.totalorder %s3300_s16, 2 }
  0x98   : > { %p4203_p3 = scmp.ne.s32.totalorder (!%p1972_p4), %s4193_s23, 0 }
  0x99   : > { %371 = sbr.rel (%p1972_p4) target bundleno = 233 (0xe9), region = 44 }
  0xa0   : > { %374 = sbr.rel (!%p4203_p3) target bundleno = 195 (0xc3), region = 48  ;;  %s375_s28 = sand.u32 (%p4203_p3), 1, %s3296_s15  }
  0xa1   : > { %s380_s12 = smul.u32 (%p4203_p3), 6, %s3300_s16  ;;  %s3576_s13 = scalar_lea.sflag (%p4203_p3), [#allocation3], %s375_s28 }
  0xa2   : > { %s2814_s3 = smul.u32 (%p4203_p3), 48, %s375_s28 }
  0xa3   : > { %s381_s10 = ssub.s32 (%p4203_p3), 9, %s380_s12 }
  0xa4   : > { %p382_p5 = scmp.lt.s32.totalorder (%p4203_p3), %s381_s10, 6  ;;  %s379_s26 = scalar_lea.vmem (%p4203_p3), [#allocation2], %s2814_s3 }
  0xa7   : > { %s4230_s10 = smov (!%p382_p5, %s381_s10), 6 }
  0xa8   : > { %s3573_s30 = sshll.u32 %s4230_s10, 7 }
  0xa9   : > { %s386_s8 = ssub.s32 768, %s3573_s30 }
  0xaa   : > { %387 = vsyncadd %s3576_s13, %s386_s8  ;;  %p1974_p2 = scmp.ne.s32.totalorder %s3573_s30, 0  ;;  %s2014_s21 = smul.u32 768, %s3300_s16 }
  0xab   : > { %s392_s11 = sshll.u32 %s379_s26, 4  ;;  %s3134_s25 = scalar_lea.hbm %s4165_s0, 1152  ;;  %s3586_s11 = int_to_ptr.vmem [resolvable:$true] %s392_s11 }
  0xac   : > { %s3584_s19 = scalar_lea.hbm %s4165_s0, %s2014_s21 }
  0xad   : > { %s3130_s22 = scalar_lea.hbm %s3584_s19, %s3573_s30  ;;  %p3135_p13 = scmp.lt.u32.totalorder %s3584_s19, %s4165_s0 }
  0xae   : > { %p3131_p6 = scmp.ne.s32.totalorder %s3584_s19, %s3130_s22  ;;  %p3136_p0 = scmp.lt.u32.totalorder %s3134_s25, %s3130_s22 }
  0xaf   : > { %p3138_p8 = scmp.lt.u32.totalorder %s3130_s22, %s3584_s19 }
  0xb0   : > { %p3132_p11 = pnand %p3131_p6, %p1974_p2  ;;  %p3137_p7 = por %p3136_p0, %p3135_p13 }
  0xb2   : > { %p3133_p12 = pneg %p3132_p11  ;;  %p3139_p9 = por %p3138_p8, %p3137_p7 }
  0xb4   : > { %p3140_p10 = pnand %p3139_p9, %p3133_p12 }
  0xb6   : > { %3143 = shalt.err (!%p3140_p10)
}
  0xb7   : > { %s3144_s3 = scalar_lea.vmem %s3586_s11, %s3573_s30  ;;  %s3311_s10 = smov [#allocation2]  }
  0xb8   : > { %p3145_p1 = scmp.ne.s32.totalorder %s3586_s11, %s3144_s3  ;;  %s3148_s8 = sshll.u32 %s3311_s10, 4  ;;  %s3149_s8 = int_to_ptr.vmem [resolvable:$false] %s3148_s8 }
  0xb9   : > { %s3150_s26 = scalar_lea.vmem %s3149_s8, 1536  ;;  %p3151_p6 = scmp.lt.s32.totalorder %s3586_s11, %s3149_s8 }
  0xba   : > { %p3146_p3 = pnand %p3145_p1, %p1974_p2  ;;  %p3152_p11 = scmp.lt.s32.totalorder %s3150_s26, %s3144_s3 }
  0xbc   : > { %p3147_p5 = pneg %p3146_p3  ;;  %p3153_p13 = por %p3152_p11, %p3151_p6 }
  0xbe   : > { %p3154_p0 = pnand %p3153_p13, %p3147_p5 }
  0xc0   : > { %3157 = shalt.err (!%p3154_p0)
}
  0xc1   : > { %s3312_s21 = smov 128   ;;  %s3313_s18 = smov 8  }
  0xc2   : > { %398 = dma.hbm_to_vmem [thread:$0]  (%p1974_p2), %s3584_s19, %s3573_s30, %s3586_s11, %s3576_s13, %s3312_s21, %s3312_s21, %s3313_s18  }
  0xc3 PF: > { %p4204_p12 = scmp.ne.s32.totalorder %s4193_s23, 0 }
  0xc4   : > { %s402_s29 = sand.u32 (%p4204_p12), 1, %s3300_s16   ;;  %s404_s22 = sand.u32 (%p4204_p12), 1, %s3296_s15  }
  0xc5   : > { %401 = sbr.rel (!%p4204_p12) target bundleno = 233 (0xe9), region = 52  ;;  %s3621_s3 = scalar_lea.sflag (%p4204_p12), [#allocation6], %s402_s29 }
  0xc6   : > { %s2815_s20 = smul.u32 (%p4204_p12), 144, %s404_s22 }
  0xc7   : > { %s407_s9 = smul.u32 (%p4204_p12), 6, %s3300_s16 }
  0xc8   : > { %s406_s30 = scalar_lea.vmem (%p4204_p12), [#allocation5], %s2815_s20 }
  0xc9   : > { %s408_s25 = ssub.s32 (%p4204_p12), 9, %s407_s9 }
  0xca   : > { %p409_p7 = scmp.lt.s32.totalorder (%p4204_p12), %s408_s25, 6 }
  0xcc   : > { %s4232_s25 = smov (!%p409_p7, %s408_s25), 6 }
  0xcd   : > { %s3618_s28 = smul.u32 384, %s4232_s25 }
  0xcf   : > { %s414_s12 = ssub.s32 2304, %s3618_s28 }
  0xd0   : > { %415 = vsyncadd %s3621_s3, %s414_s12  ;;  %p1980_p2 = scmp.ne.s32.totalorder %s3618_s28, 0  ;;  %s2872_s23 = smul.u32 2304, %s3300_s16 }
  0xd1   : > { %s421_s13 = sshll.u32 %s406_s30, 4  ;;  %s3162_s18 = scalar_lea.hbm %s4166_s1, 3456  ;;  %s3631_s13 = int_to_ptr.vmem [resolvable:$true] %s421_s13 }
  0xd2   : > { %s3629_s10 = scalar_lea.hbm %s4166_s1, %s2872_s23 }
  0xd3   : > { %s3158_s8 = scalar_lea.hbm %s3629_s10, %s3618_s28  ;;  %p3163_p1 = scmp.lt.u32.totalorder %s3629_s10, %s4166_s1 }
  0xd4   : > { %p3159_p8 = scmp.ne.s32.totalorder %s3629_s10, %s3158_s8  ;;  %p3164_p3 = scmp.lt.u32.totalorder %s3162_s18, %s3158_s8 }
  0xd5   : > { %p3166_p6 = scmp.lt.u32.totalorder %s3158_s8, %s3629_s10 }
  0xd6   : > { %p3160_p9 = pnand %p3159_p8, %p1980_p2  ;;  %p3165_p5 = por %p3164_p3, %p3163_p1 }
  0xd8   : > { %p3161_p10 = pneg %p3160_p9  ;;  %p3167_p11 = por %p3166_p6, %p3165_p5 }
  0xda   : > { %p3168_p13 = pnand %p3167_p11, %p3161_p10 }
  0xdc   : > { %3171 = shalt.err (!%p3168_p13)
}
  0xdd   : > { %s3172_s20 = scalar_lea.vmem %s3631_s13, %s3618_s28  ;;  %s3314_s9 = smov [#allocation5]  }
  0xde   : > { %p3173_p0 = scmp.ne.s32.totalorder %s3631_s13, %s3172_s20  ;;  %s3176_s25 = sshll.u32 %s3314_s9, 4  ;;  %s3177_s25 = int_to_ptr.vmem [resolvable:$false] %s3176_s25 }
  0xdf   : > { %s3178_s12 = scalar_lea.vmem %s3177_s25, 4608  ;;  %p3179_p8 = scmp.lt.s32.totalorder %s3631_s13, %s3177_s25 }
  0xe0   : > { %p3174_p12 = pnand %p3173_p0, %p1980_p2  ;;  %p3180_p9 = scmp.lt.s32.totalorder %s3178_s12, %s3172_s20 }
  0xe2   : > { %p3175_p7 = pneg %p3174_p12  ;;  %p3181_p1 = por %p3180_p9, %p3179_p8 }
  0xe4   : > { %p3182_p3 = pnand %p3181_p1, %p3175_p7 }
  0xe6   : > { %3185 = shalt.err (!%p3182_p3)
}
  0xe7   : > { %s3315_s30 = smov 384   ;;  %s3316_s23 = smov 24  }
  0xe8   : > { %427 = dma.hbm_to_vmem [thread:$0]  (%p1980_p2), %s3629_s10, %s3618_s28, %s3631_s13, %s3621_s3, %s3315_s30, %s3315_s30, %s3316_s23  }
  0xe9 PF: > { %p4205_p10 = scmp.ne.s32.totalorder %s4199_s27, 0 }
  0xea   : > { %s3661_s11 = sand.u32 (!%p4205_p10), 1, %s3292_s14   ;;  %p4206_p5 = scmp.ne.s32.totalorder (!%p4205_p10), %s4194_s24, 0 }
  0xeb   : > { %433 = sbr.rel (%p4205_p10) target bundleno = 1200 (0x4b0), region = 56  ;;  %s436_s8 = scalar_lea.sflag (!%p4205_p10), [#allocation3], %s3661_s11 }
  0xec   : > { %s2817_s19 = smul.u32 (!%p4205_p10), 48, %s3661_s11 }
  0xee   : > { %s3667_s26 = scalar_lea.vmem (!%p4205_p10), [#allocation2], %s2817_s19 }
  0xf2   : > { %3259 = dma.done.wait (%p4206_p5), %s436_s8, 768  }
  0xf3   : > { %3261 = vsyncadd (%p4206_p5), %s436_s8, 4294966528  ;;  %s444_s27 = sand.u32 1, %s3400_s17   ;;  %s2818_s28 = smul.u32 144, %s3661_s11 }
  0xf4   : > { %s445_s3 = scalar_lea.sflag [#allocation6], %s444_s27 }
  0xf5   : > { %s3677_s13 = scalar_lea.vmem [#allocation5], %s2818_s28 }
  0xf6   : > { %3263 = dma.done.wait (%p4206_p5), %s445_s3, 2304  }
  0xf7   : > { %3265 = vsyncadd (%p4206_p5), %s445_s3, 4294964992  ;;  %p4207_p2 = scmp.eq.s32.totalorder %s3400_s17, 0 }
  0xf9   : > { %3267 = dma.done.wait (%p4207_p2), [#allocation6], 2048   ;;  %p4208_p6 = pmov %p4207_p2 }
  0xfa   : > { %p4209_p11 = pmov %p4207_p2 }
  0xfb   : > { %3269 = vsyncadd (%p4208_p6), [#allocation6], 4294965248 }
  0xfc   : > { %3271 = dma.done.wait (%p4209_p11), [#allocation9], 4096   ;;  %p4210_p13 = pmov %p4207_p2 }
  0xfd   : > { %p4211_p0 = pmov %p4207_p2 }
  0xfe   : > { %3273 = vsyncadd (%p4210_p13), [#allocation9], 4294963200 }
  0xff   : > { %3275 = dma.done.wait (%p4211_p0), [#allocation12], 6144   ;;  %p4212_p12 = pmov %p4211_p0 }
 0x100   : > { %v537_v0 = vld [vmem:[#allocation7] sm:$0xff]  ;;  %v538_v1 = vld [vmem:[#allocation7 + $0x8] sm:$0xff]  ;;  %v539_v2 = vld [vmem:[#allocation7 + $0x10] sm:$0xff]  ;;  %s4213_s29 = sld [smem:[#allocation30_spill]]  ;;  %s3992_s22 = scalar_lea.vmem [#allocation15], %s2818_s28 }
 0x101   : > { %3277 = vsyncadd (%p4212_p12), [#allocation12], 4294961152  ;;  %v3695_v3 = vpack.c.bf16 %v538_v1, %v537_v0  ;;  %v540_v4 = vld [vmem:[#allocation7 + $0x18] sm:$0xff]  ;;  %v541_v6 = vld [vmem:[#allocation7 + $0x20] sm:$0xff]  ;;  %s4046_s20 = scalar_lea.vmem [#allocation14], %s2817_s19  ;;  %s1742_s9 = scalar_lea.sflag [#allocation4], %s3661_s11 }
 0x102   : > { %v3697_v5 = vpack.c.bf16 %v540_v4, %v539_v2  ;;  %v542_v7 = vld [vmem:[#allocation7 + $0x28] sm:$0xff]  ;;  %v569_v9 = vld [vmem:[%s3677_s13] sm:$0xff]  ;;  %v544_v11 = vld [vmem:[#allocation7 + $0x38] sm:$0xff]  ;;  %s1747_s25 = scalar_lea.sflag [#allocation16], %s3661_s11  ;;  %s4214_s12 = sld [smem:[#allocation27_spill]] }
 0x103   : > { %2521 = vmatprep.subr.bf16.mxu0 %v3695_v3  ;;  %v3702_v8 = vpack.c.bf16 %v542_v7, %v541_v6  ;;  %v543_v10 = vld [vmem:[#allocation7 + $0x30] sm:$0xff]  ;;  %2224 = vmatprep.mubr.f32.mxu0 %v569_v9  ;;  %v545_v13 = vld [vmem:[#allocation7 + $0x40] sm:$0xff]  ;;  %v546_v14 = vld [vmem:[#allocation7 + $0x48] sm:$0xff] }
 0x104   : > { %2523 = vmatpush3.bf16.msra.mxu0 %v3695_v3  ;;  %2265 = vmatprep.mubr.f32.mxu1 %v569_v9  ;;  %v3707_v12 = vpack.c.bf16 %v544_v11, %v543_v10  ;;  %v3711_v15 = vpack.c.bf16 %v546_v14, %v545_v13  ;;  %v547_v16 = vld [vmem:[#allocation7 + $0x50] sm:$0xff]  ;;  %v548_v17 = vld [vmem:[#allocation7 + $0x58] sm:$0xff]  ;;  %v549_v19 = vld [vmem:[#allocation7 + $0x60] sm:$0xff] }
 0x105   : > { %2525 = vmatprep.subr.bf16.mxu0 %v3697_v5  ;;  %v3715_v18 = vpack.c.bf16 %v548_v17, %v547_v16  ;;  %v550_v20 = vld [vmem:[#allocation7 + $0x68] sm:$0xff]  ;;  %v551_v22 = vld [vmem:[#allocation7 + $0x70] sm:$0xff]  ;;  %v552_v23 = vld [vmem:[#allocation7 + $0x78] sm:$0xff] }
 0x106   : > { %v2544_v21 = vpack.c.bf16 %v550_v20, %v549_v19  ;;  %v2548_v24 = vpack.c.bf16 %v552_v23, %v551_v22  ;;  %v3721_v25 = vld [vmem:[%s3677_s13 + $0x18] sm:$0xff]  ;;  %v3725_v26 = vld [vmem:[%s3677_s13 + $0x30] sm:$0xff]  ;;  %v3731_v27 = vld [vmem:[%s3677_s13 + $0x48] sm:$0xff] }
 0x107   : > { %v3735_v28 = vld [vmem:[%s3677_s13 + $0x60] sm:$0xff]  ;;  %v3741_v29 = vld [vmem:[%s3677_s13 + $0x78] sm:$0xff]  ;;  %v3745_v30 = vld [vmem:[%s3677_s13 + $0x8] sm:$0xff] }
 0x108   : > { %2527 = vmatpush3.bf16.msra.mxu0 %v3697_v5  ;;  %v3757_v31 = vld [vmem:[%s3677_s13 + $0x20] sm:$0xff]  ;;  %v3761_v32 = vld [vmem:[%s3677_s13 + $0x38] sm:$0xff]  ;;  %v3767_v33 = vld [vmem:[%s3677_s13 + $0x50] sm:$0xff]  ;;  %p4215_p7 = scmp.ne.s32.totalorder %s4214_s12, 0 }
 0x109   : > { %2529 = vmatprep.subr.bf16.mxu0 %v3702_v8  ;;  %v3771_v34 = vld [vmem:[%s3677_s13 + $0x68] sm:$0xff]  ;;  %v3777_v35 = vld [vmem:[%s3677_s13 + $0x80] sm:$0xff]  ;;  %v3781_v36 = vld [vmem:[%s3677_s13 + $0x10] sm:$0xff]  ;;  %s1754_s30 = smul.u32 (%p4215_p7), 6, %s3400_s17 }
 0x10a   : > { %v3793_v37 = vld [vmem:[%s3677_s13 + $0x28] sm:$0xff]  ;;  %v3796_v38 = vld [vmem:[%s3677_s13 + $0x40] sm:$0xff]  ;;  %v3801_v39 = vld [vmem:[%s3677_s13 + $0x58] sm:$0xff] }
 0x10b   : > { %v3804_v40 = vld [vmem:[%s3677_s13 + $0x70] sm:$0xff]  ;;  %v3809_v41 = vld [vmem:[%s3677_s13 + $0x88] sm:$0xff]  ;;  %s1755_s23 = ssub.s32 (%p4215_p7), 9, %s1754_s30 }
 0x10c   : > { %2531 = vmatpush3.bf16.msra.mxu0 %v3702_v8  ;;  %v1251_v42 = vld [vmem:[#allocation11] sm:$0xff]  ;;  %v1252_v43 = vld [vmem:[#allocation11 + $0x8] sm:$0xff]  ;;  %v1253_v44 = vld [vmem:[#allocation11 + $0x10] sm:$0xff]  ;;  %p1756_p8 = scmp.lt.s32.totalorder (%p4215_p7), %s1755_s23, 6 }
 0x10d   : > { %2533 = vmatprep.subr.bf16.mxu0 %v3707_v12  ;;  %v2712_v45 = vpack.c.bf16 %v1252_v43, %v1251_v42  ;;  %v1254_v46 = vld [vmem:[#allocation11 + $0x18] sm:$0xff]  ;;  %v1255_v48 = vld [vmem:[#allocation11 + $0x20] sm:$0xff]  ;;  %v1256_v49 = vld [vmem:[#allocation11 + $0x28] sm:$0xff] }
 0x10e   : > { %v2716_v47 = vpack.c.bf16 %v1254_v46, %v1253_v44  ;;  %v2720_v50 = vpack.c.bf16 %v1256_v49, %v1255_v48  ;;  %v1257_v51 = vld [vmem:[#allocation11 + $0x30] sm:$0xff]  ;;  %v1258_v52 = vld [vmem:[#allocation11 + $0x38] sm:$0xff]  ;;  %v1259_v54 = vld [vmem:[#allocation11 + $0x40] sm:$0xff] }
 0x10f   : > { %v2724_v53 = vpack.c.bf16 %v1258_v52, %v1257_v51  ;;  %v1260_v55 = vld [vmem:[#allocation11 + $0x48] sm:$0xff]  ;;  %v1261_v57 = vld [vmem:[#allocation11 + $0x50] sm:$0xff]  ;;  %v1262_v58 = vld [vmem:[#allocation11 + $0x58] sm:$0xff] }
 0x110   : > { %2535 = vmatpush3.bf16.msra.mxu0 %v3707_v12  ;;  %v2728_v56 = vpack.c.bf16 %v1260_v55, %v1259_v54  ;;  %v2732_v59 = vpack.c.bf16 %v1262_v58, %v1261_v57  ;;  %v1263_v60 = vld [vmem:[#allocation11 + $0x60] sm:$0xff]  ;;  %v1264_v61 = vld [vmem:[#allocation11 + $0x68] sm:$0xff]  ;;  %v1265_v63 = vld [vmem:[#allocation11 + $0x70] sm:$0xff] }
 0x111   : > { %2537 = vmatprep.subr.bf16.mxu0 %v3711_v15  ;;  %v2736_v62 = vpack.c.bf16 %v1264_v61, %v1263_v60  ;;  %v1266_v0 = vld [vmem:[#allocation11 + $0x78] sm:$0xff]  ;;  %v1235_v2 = vld [vmem:[#allocation10] sm:$0xff]  ;;  %v554_v6 = vld [vmem:[#allocation8 + $0x8] sm:$0xff] }
 0x112   : > { %v2740_v1 = vpack.c.bf16 %v1266_v0, %v1265_v63  ;;  %v555_v7 = vld [vmem:[#allocation8 + $0x10] sm:$0xff]  ;;  %v556_v9 = vld [vmem:[#allocation8 + $0x18] sm:$0xff]  ;;  %v558_v13 = vld [vmem:[#allocation8 + $0x28] sm:$0xff] }
 0x113   : > { %v3817_v11 = vpack.c.bf16 %v556_v9, %v555_v7  ;;  %v559_v17 = vld [vmem:[#allocation8 + $0x30] sm:$0xff]  ;;  %v561_v22 = vld [vmem:[#allocation8 + $0x40] sm:$0xff]  ;;  %v562_v23 = vld [vmem:[#allocation8 + $0x48] sm:$0xff] }
 0x114   : > { %2539 = vmatpush3.bf16.msra.mxu0 %v3711_v15  ;;  %v3830_v42 = vpack.c.bf16 %v562_v23, %v561_v22  ;;  %v563_v43 = vld [vmem:[#allocation8 + $0x50] sm:$0xff]  ;;  %v564_v44 = vld [vmem:[#allocation8 + $0x58] sm:$0xff]  ;;  %v565_v46 = vld [vmem:[#allocation8 + $0x60] sm:$0xff] }
 0x115   : > { %2541 = vmatprep.subr.bf16.mxu0 %v3715_v18  ;;  %v567_v49 = vld [vmem:[#allocation8 + $0x70] sm:$0xff] }
 0x118   : > { %2543 = vmatpush3.bf16.msra.mxu0 %v3715_v18 }
 0x119   : > { %2545 = vmatprep.subr.bf16.mxu0 %v2544_v21 }
 0x11c   : > { %2547 = vmatpush3.bf16.msra.mxu0 %v2544_v21 }
 0x11d   : > { %2549 = vmatprep.subr.bf16.mxu0 %v2548_v24 }
 0x120   : > { %2551 = vmatpush3.bf16.msra.mxu0 %v2548_v24 }
 0x121   : > { %2585 = vmatprep.subr.bf16.mxu0 %v3695_v3 }
 0x123   : > { %2225 = vmatmul.mubr.f32.vlgmr.msra.gmra.mrb[0].mxu0 %v3721_v25 }
 0x124   : > { %2587 = vmatpush3.bf16.msra.mxu0 %v3695_v3  ;;  %2227 = vmatprep.mubr.f32.mxu0 %v3725_v26 }
 0x125   : > { %2589 = vmatprep.subr.bf16.mxu0 %v3697_v5 }
 0x127   : > { %2228 = vmatmul.mubr.f32.gmra.mrb[2].mxu0 %v3731_v27 }
 0x128   : > { %2591 = vmatpush3.bf16.msra.mxu0 %v3697_v5  ;;  %2230 = vmatprep.mubr.f32.mxu0 %v3735_v28 }
 0x129   : > { %2593 = vmatprep.subr.bf16.mxu0 %v3702_v8 }
 0x12b   : > { %2231 = vmatmul.mubr.f32.gmra.mrb[4].mxu0 %v3741_v29 }
 0x12c   : > { %2595 = vmatpush3.bf16.msra.mxu0 %v3702_v8  ;;  %2306 = vmatprep.mubr.f32.mxu0 %v3745_v30 }
 0x12d   : > { %2597 = vmatprep.subr.bf16.mxu0 %v3707_v12 }
 0x130   : > { %2599 = vmatpush3.bf16.msra.mxu0 %v3707_v12 }
 0x131   : > { %2601 = vmatprep.subr.bf16.mxu0 %v3711_v15 }
 0x134   : > { %2603 = vmatpush3.bf16.msra.mxu0 %v3711_v15 }
 0x135   : > { %2605 = vmatprep.subr.bf16.mxu0 %v3715_v18 }
 0x138   : > { %2607 = vmatpush3.bf16.msra.mxu0 %v3715_v18 }
 0x139   : > { %2609 = vmatprep.subr.bf16.mxu0 %v2544_v21 }
 0x13c   : > { %2611 = vmatpush3.bf16.msra.mxu0 %v2544_v21 }
 0x13d   : > { %2613 = vmatprep.subr.bf16.mxu0 %v2548_v24 }
 0x140   : > { %2615 = vmatpush3.bf16.msra.mxu0 %v2548_v24 }
 0x141   : > { %2649 = vmatprep.subr.bf16.mxu0 %v3695_v3 }
 0x143   : > { %2307 = vmatmul.mubr.f32.vlgmr.msra.gmra.mrb[6].mxu0 %v3757_v31 }
 0x144   : > { %2651 = vmatpush3.bf16.msra.mxu0 %v3695_v3  ;;  %2309 = vmatprep.mubr.f32.mxu0 %v3761_v32  ;;  %v1236_v3 = vld [vmem:[#allocation10 + $0x8] sm:$0xff] }
 0x145   : > { %2653 = vmatprep.subr.bf16.mxu0 %v3697_v5  ;;  %v3812_v4 = vpack.c.bf16 %v1236_v3, %v1235_v2 }
 0x147   : > { %2310 = vmatmul.mubr.f32.gmra.mrb[8].mxu0 %v3767_v33 }
 0x148   : > { %2655 = vmatpush3.bf16.msra.mxu0 %v3697_v5  ;;  %2312 = vmatprep.mubr.f32.mxu0 %v3771_v34  ;;  %v553_v5 = vld [vmem:[#allocation8] sm:$0xff] }
 0x149   : > { %2657 = vmatprep.subr.bf16.mxu0 %v3702_v8 }
 0x14b   : > { %2313 = vmatmul.mubr.f32.gmra.mrb[10].mxu0 %v3777_v35 }
 0x14c   : > { %2659 = vmatpush3.bf16.msra.mxu0 %v3702_v8  ;;  %2388 = vmatprep.mubr.f32.mxu0 %v3781_v36  ;;  %v3815_v8 = vpack.c.bf16 %v554_v6, %v553_v5 }
 0x14d   : > { %2661 = vmatprep.subr.bf16.mxu0 %v3707_v12 }
 0x14e   : > { %2553 = vmatprep.subr.bf16.mxu1 %v3815_v8 }
 0x14f   : > { %2555 = vmatpush3.bf16.msra.mxu1 %v3815_v8 }
 0x150   : > { %2663 = vmatpush3.bf16.msra.mxu0 %v3707_v12  ;;  %v557_v12 = vld [vmem:[#allocation8 + $0x20] sm:$0xff]  ;;  %2557 = vmatprep.subr.bf16.mxu1 %v3817_v11 }
 0x151   : > { %2665 = vmatprep.subr.bf16.mxu0 %v3711_v15 }
 0x153   : > { %2559 = vmatpush3.bf16.msra.mxu1 %v3817_v11 }
 0x154   : > { %2667 = vmatpush3.bf16.msra.mxu0 %v3711_v15  ;;  %v3822_v15 = vpack.c.bf16 %v558_v13, %v557_v12 }
 0x155   : > { %2669 = vmatprep.subr.bf16.mxu0 %v3715_v18 }
 0x156   : > { %2561 = vmatprep.subr.bf16.mxu1 %v3822_v15 }
 0x157   : > { %2563 = vmatpush3.bf16.msra.mxu1 %v3822_v15 }
 0x158   : > { %2671 = vmatpush3.bf16.msra.mxu0 %v3715_v18  ;;  %v560_v18 = vld [vmem:[#allocation8 + $0x38] sm:$0xff] }
 0x159   : > { %2673 = vmatprep.subr.bf16.mxu0 %v2544_v21  ;;  %v3826_v20 = vpack.c.bf16 %v560_v18, %v559_v17 }
 0x15b   : > { %2565 = vmatprep.subr.bf16.mxu1 %v3826_v20 }
 0x15c   : > { %2675 = vmatpush3.bf16.msra.mxu0 %v2544_v21  ;;  %2567 = vmatpush3.bf16.msra.mxu1 %v3826_v20 }
 0x15d   : > { %2677 = vmatprep.subr.bf16.mxu0 %v2548_v24  ;;  %2569 = vmatprep.subr.bf16.mxu1 %v3830_v42 }
 0x160   : > { %2679 = vmatpush3.bf16.msra.mxu0 %v2548_v24  ;;  %2571 = vmatpush3.bf16.msra.mxu1 %v3830_v42 }
 0x161   : > { %2713 = vmatprep.subr.bf16.mxu0 %v2712_v45 }
 0x163   : > { %2389 = vmatmul.mubr.f32.vlgmr.msra.gmra.mrb[12].mxu0 %v3793_v37 }
 0x164   : > { %2391 = vmatprep.mubr.f32.mxu0 %v3796_v38  ;;  %2715 = vmatpush3.bf16.msra.mxu0 %v2712_v45  ;;  %v3834_v45 = vpack.c.bf16 %v564_v44, %v563_v43  ;;  %v1238_v43 = vld [vmem:[#allocation10 + $0x18] sm:$0xff] }
 0x165   : > { %2717 = vmatprep.subr.bf16.mxu0 %v2716_v47 }
 0x166   : > { %2573 = vmatprep.subr.bf16.mxu1 %v3834_v45 }
 0x167   : > { %2392 = vmatmul.mubr.f32.gmra.mrb[14].mxu0 %v3801_v39  ;;  %2575 = vmatpush3.bf16.msra.mxu1 %v3834_v45 }
 0x168   : > { %2394 = vmatprep.mubr.f32.mxu0 %v3804_v40  ;;  %2719 = vmatpush3.bf16.msra.mxu0 %v2716_v47  ;;  %v566_v47 = vld [vmem:[#allocation8 + $0x68] sm:$0xff] }
 0x169   : > { %2721 = vmatprep.subr.bf16.mxu0 %v2720_v50  ;;  %v3838_v48 = vpack.c.bf16 %v566_v47, %v565_v46 }
 0x16b   : > { %2395 = vmatmul.mubr.f32.gmra.mrb[16].mxu0 %v3809_v41  ;;  %2577 = vmatprep.subr.bf16.mxu1 %v3838_v48 }
 0x16c   : > { %2723 = vmatpush3.bf16.msra.mxu0 %v2720_v50  ;;  %v568_v50 = vld [vmem:[#allocation8 + $0x78] sm:$0xff]  ;;  %2579 = vmatpush3.bf16.msra.mxu1 %v3838_v48 }
 0x16d   : > { %2725 = vmatprep.subr.bf16.mxu0 %v2724_v53  ;;  %v3842_v51 = vpack.c.bf16 %v568_v50, %v567_v49 }
 0x16f   : > { %2581 = vmatprep.subr.bf16.mxu1 %v3842_v51 }
 0x170   : > { %2727 = vmatpush3.bf16.msra.mxu0 %v2724_v53  ;;  %2583 = vmatpush3.bf16.msra.mxu1 %v3842_v51 }
 0x171   : > { %2729 = vmatprep.subr.bf16.mxu0 %v2728_v56  ;;  %2617 = vmatprep.subr.bf16.mxu1 %v3815_v8 }
 0x173   : > { %2266 = vmatmul.mubr.f32.vlgmr.msra.gmra.mrb[0].mxu1 %v3721_v25 }
 0x174   : > { %2731 = vmatpush3.bf16.msra.mxu0 %v2728_v56  ;;  %2619 = vmatpush3.bf16.msra.mxu1 %v3815_v8 }
 0x175   : > { %2733 = vmatprep.subr.bf16.mxu0 %v2732_v59  ;;  %2268 = vmatprep.mubr.f32.mxu1 %v3725_v26 }
 0x176   : > { %2621 = vmatprep.subr.bf16.mxu1 %v3817_v11 }
 0x177   : > { %2269 = vmatmul.mubr.f32.gmra.mrb[2].mxu1 %v3731_v27 }
 0x178   : > { %2735 = vmatpush3.bf16.msra.mxu0 %v2732_v59  ;;  %2623 = vmatpush3.bf16.msra.mxu1 %v3817_v11 }
 0x179   : > { %2737 = vmatprep.subr.bf16.mxu0 %v2736_v62  ;;  %2271 = vmatprep.mubr.f32.mxu1 %v3735_v28 }
 0x17a   : > { %2625 = vmatprep.subr.bf16.mxu1 %v3822_v15 }
 0x17b   : > { %2272 = vmatmul.mubr.f32.gmra.mrb[4].mxu1 %v3741_v29 }
 0x17c   : > { %2739 = vmatpush3.bf16.msra.mxu0 %v2736_v62  ;;  %2627 = vmatpush3.bf16.msra.mxu1 %v3822_v15 }
 0x17d   : > { %2741 = vmatprep.subr.bf16.mxu0 %v2740_v1  ;;  %2347 = vmatprep.mubr.f32.mxu1 %v3745_v30 }
 0x17e   : > { %2629 = vmatprep.subr.bf16.mxu1 %v3826_v20 }
 0x180   : > { %2743 = vmatpush3.bf16.msra.mxu0 %v2740_v1  ;;  %2631 = vmatpush3.bf16.msra.mxu1 %v3826_v20 }
 0x181   : > { %2745 = vmatprep.subr.bf16.mxu0 %v3812_v4  ;;  %2633 = vmatprep.subr.bf16.mxu1 %v3830_v42 }
 0x184   : > { %2635 = vmatpush3.bf16.msra.mxu1 %v3830_v42 }
 0x185   : > { %2637 = vmatprep.subr.bf16.mxu1 %v3834_v45 }
 0x188   : > { %2639 = vmatpush3.bf16.msra.mxu1 %v3834_v45 }
 0x189   : > { %2641 = vmatprep.subr.bf16.mxu1 %v3838_v48 }
 0x18c   : > { %2643 = vmatpush3.bf16.msra.mxu1 %v3838_v48 }
 0x18d   : > { %2645 = vmatprep.subr.bf16.mxu1 %v3842_v51 }
 0x190   : > { %2647 = vmatpush3.bf16.msra.mxu1 %v3842_v51 }
 0x191   : > { %2681 = vmatprep.subr.bf16.mxu1 %v3815_v8 }
 0x193   : > { %2348 = vmatmul.mubr.f32.vlgmr.msra.gmra.mrb[6].mxu1 %v3757_v31 }
 0x194   : > { %2683 = vmatpush3.bf16.msra.mxu1 %v3815_v8  ;;  %2350 = vmatprep.mubr.f32.mxu1 %v3761_v32 }
 0x195   : > { %2685 = vmatprep.subr.bf16.mxu1 %v3817_v11 }
 0x197   : > { %2351 = vmatmul.mubr.f32.gmra.mrb[8].mxu1 %v3767_v33 }
 0x198   : > { %2687 = vmatpush3.bf16.msra.mxu1 %v3817_v11  ;;  %2353 = vmatprep.mubr.f32.mxu1 %v3771_v34 }
 0x199   : > { %2689 = vmatprep.subr.bf16.mxu1 %v3822_v15 }
 0x19b   : > { %2354 = vmatmul.mubr.f32.gmra.mrb[10].mxu1 %v3777_v35 }
 0x19c   : > { %2691 = vmatpush3.bf16.msra.mxu1 %v3822_v15  ;;  %2429 = vmatprep.mubr.f32.mxu1 %v3781_v36  ;;  %v1237_v36 = vld [vmem:[#allocation10 + $0x10] sm:$0xff] }
 0x19d   : > { %2693 = vmatprep.subr.bf16.mxu1 %v3826_v20 }
 0x1a0   : > { %2695 = vmatpush3.bf16.msra.mxu1 %v3826_v20 }
 0x1a1   : > { %2697 = vmatprep.subr.bf16.mxu1 %v3830_v42 }
 0x1a4   : > { %2699 = vmatpush3.bf16.msra.mxu1 %v3830_v42 }
 0x1a5   : > { %2701 = vmatprep.subr.bf16.mxu1 %v3834_v45 }
 0x1a8   : > { %2703 = vmatpush3.bf16.msra.mxu1 %v3834_v45 }
 0x1a9   : > { %2705 = vmatprep.subr.bf16.mxu1 %v3838_v48 }
 0x1ac   : > { %2707 = vmatpush3.bf16.msra.mxu1 %v3838_v48 }
 0x1ad   : > { %2709 = vmatprep.subr.bf16.mxu1 %v3842_v51 }
 0x1b0   : > { %2711 = vmatpush3.bf16.msra.mxu1 %v3842_v51 }
 0x1b3   : > { %2430 = vmatmul.mubr.f32.vlgmr.msra.gmra.mrb[12].mxu1 %v3793_v37  ;;  %v1250_v37 = vld [vmem:[#allocation10 + $0x78] sm:$0xff] }
 0x1b4   : > { %2432 = vmatprep.mubr.f32.mxu1 %v3796_v38 }
 0x1b7   : > { %2433 = vmatmul.mubr.f32.gmra.mrb[14].mxu1 %v3801_v39  ;;  %v1231_v39 = vld [vmem:[%s3667_s26 + $0x10] sm:$0xff] }
 0x1b8   : > { %2435 = vmatprep.mubr.f32.mxu1 %v3804_v40  ;;  %v1232_v40 = vld [vmem:[%s3667_s26 + $0x18] sm:$0xff] }
 0x1bb   : > { %2436 = vmatmul.mubr.f32.gmra.mrb[16].mxu1 %v3809_v41  ;;  %v1512_v41 = vld [vmem:[#allocation13] sm:$0xff] }
 0x1f6   : > { %v2226_v10 = vpop.f32.mrb[0].mxu0 }
 0x1f7   : > { %v641_v14 = vpop.f32.mrb[1].mxu0  ;;  %v671_v53 = vmul.f32 %v2226_v10, %v2226_v10 }
 0x1f8   : > { %v670_v56 = vmul.f32 %v641_v14, %v641_v14 }
 0x1fa   : > { %v2229_v16 = vpop.f32.mrb[2].mxu0 }
 0x1fb   : > { %v651_v19 = vpop.f32.mrb[3].mxu0  ;;  %v673_v61 = vmul.f32 %v2229_v16, %v2229_v16 }
 0x1fc   : > { %v672_v0 = vmul.f32 %v651_v19, %v651_v19 }
 0x1fe   : > { %v2232_v21 = vpop.f32.mrb[4].mxu0 }
 0x1ff   : > { %v661_v24 = vpop.f32.mrb[5].mxu0  ;;  %v675_v3 = vmul.f32 %v2232_v21, %v2232_v21 }
 0x200   : > { %v674_v7 = vmul.f32 %v661_v24, %v661_v24 }
 0x216   : > { %v2308_v52 = vpop.f32.mrb[6].mxu0 }
 0x217   : > { %v873_v54 = vmul.f32 %v2308_v52, %v2308_v52  ;;  %v843_v55 = vpop.f32.mrb[7].mxu0 }
 0x218   : > { %v872_v57 = vmul.f32 %v843_v55, %v843_v55 }
 0x219   : > { %v879_v58 = vadd.f32 %v873_v54, %v671_v53  ;;  %v2748_v53 = vpack.c.bf16 %v1238_v43, %v1237_v36  ;;  %v1521_v43 = vld [vmem:[#allocation13 + $0x48] sm:$0xff] }
 0x21a   : > { %v878_v59 = vadd.f32 %v872_v57, %v670_v56  ;;  %v2311_v60 = vpop.f32.mrb[8].mxu0  ;;  %v1239_v57 = vld [vmem:[#allocation10 + $0x20] sm:$0xff] }
 0x21b   : > { %v875_v62 = vmul.f32 %v2311_v60, %v2311_v60  ;;  %v853_v63 = vpop.f32.mrb[9].mxu0 }
 0x21c   : > { %v874_v1 = vmul.f32 %v853_v63, %v853_v63 }
 0x21d   : > { %v881_v25 = vadd.f32 %v875_v62, %v673_v61 }
 0x21e   : > { %v880_v26 = vadd.f32 %v874_v1, %v672_v0  ;;  %v2314_v2 = vpop.f32.mrb[10].mxu0 }
 0x21f   : > { %v877_v5 = vmul.f32 %v2314_v2, %v2314_v2  ;;  %v863_v6 = vpop.f32.mrb[11].mxu0  ;;  %v1242_v2 = vld [vmem:[#allocation10 + $0x38] sm:$0xff] }
 0x220   : > { %v876_v9 = vmul.f32 %v863_v6, %v863_v6 }
 0x221   : > { %v883_v27 = vadd.f32 %v877_v5, %v675_v3 }
 0x222   : > { %v882_v28 = vadd.f32 %v876_v9, %v674_v7 }
 0x236   : > { %v2390_v29 = vpop.f32.mrb[12].mxu0 }
 0x237   : > { %v1081_v30 = vmul.f32 %v2390_v29, %v2390_v29  ;;  %v1051_v10 = vpop.f32.mrb[13].mxu0 }
 0x238   : > { %v1080_v12 = vmul.f32 %v1051_v10, %v1051_v10  ;;  %v1244_v10 = vld [vmem:[#allocation10 + $0x48] sm:$0xff] }
 0x239   : > { %v1087_v13 = vadd.f32 %v1081_v30, %v879_v58  ;;  %v1240_v58 = vld [vmem:[#allocation10 + $0x28] sm:$0xff]  ;;  %v1243_v30 = vld [vmem:[#allocation10 + $0x40] sm:$0xff] }
 0x23a   : > { %v1086_v14 = vadd.f32 %v1080_v12, %v878_v59  ;;  %v2393_v16 = vpop.f32.mrb[14].mxu0  ;;  %v2752_v1 = vpack.c.bf16 %v1240_v58, %v1239_v57  ;;  %v2760_v48 = vpack.c.bf16 %v1244_v10, %v1243_v30  ;;  %v1245_v12 = vld [vmem:[#allocation10 + $0x50] sm:$0xff]  ;;  %v1529_v57 = vld [vmem:[#allocation13 + $0x88] sm:$0xff]  ;;  %v1531_v58 = vld [vmem:[#allocation13 + $0x98] sm:$0xff]  ;;  %v3317_v10 = vmov 0.0  }
 0x23b   : > { %2930 = vrsqrt.f32 %v1087_v13  ;;  %v1083_v17 = vmul.f32 %v2393_v16, %v2393_v16  ;;  %v1061_v18 = vpop.f32.mrb[15].mxu0  ;;  %vm1196_vm0 = vcmp.eq.f32.partialorder %v1087_v13, inf  ;;  %v1199_v50 = vand.u32 2147483648, %v1087_v13  ;;  %v1247_v16 = vld [vmem:[#allocation10 + $0x60] sm:$0xff]  ;;  %1620 = vmatprep.mubr.f32.mxu1 %v3317_v10 }
 0x23c   : > { %v1082_v19 = vmul.f32 %v1061_v18, %v1061_v18  ;;  %2932 = vrsqrt.f32 %v1086_v14  ;;  %vm1189_vm1 = vcmp.eq.f32.partialorder %v1086_v14, inf  ;;  %v1192_v44 = vand.u32 2147483648, %v1086_v14  ;;  %v1249_v18 = vld [vmem:[#allocation10 + $0x70] sm:$0xff] }
 0x23d   : > { %v3877_v31 = vadd.f32 %v1083_v17, %v881_v25  ;;  %vm1191_vm2 = vcmp.eq.f32.partialorder %v1086_v14, 0.0  ;;  %vm1198_vm3 = vcmp.eq.f32.partialorder %v1087_v13, 0.0  ;;  %v1248_v17 = vld [vmem:[#allocation10 + $0x68] sm:$0xff]  ;;  %v2772_v38 = vpack.c.bf16 %v1250_v37, %v1249_v18 }
 0x23e   : > { %v1088_v32 = vadd.f32 %v1082_v19, %v880_v26  ;;  %v2396_v8 = vpop.f32.mrb[16].mxu0  ;;  %v2768_v51 = vpack.c.bf16 %v1248_v17, %v1247_v16  ;;  %v1230_v19 = vld [vmem:[%s3667_s26 + $0x8] sm:$0xff] }
 0x23f   : > { %v1085_v21 = vmul.f32 %v2396_v8, %v2396_v8  ;;  %v1071_v22 = vpop.f32.mrb[17].mxu0  ;;  %2934 = vrsqrt.f32 %v3877_v31  ;;  %vm1210_vm4 = vcmp.eq.f32.partialorder %v3877_v31, inf  ;;  %v1213_v62 = vand.u32 2147483648, %v3877_v31  ;;  %v1513_v8 = vld [vmem:[#allocation13 + $0x8] sm:$0xff] }
 0x240   : > { %v1084_v23 = vmul.f32 %v1071_v22, %v1071_v22  ;;  %2936 = vrsqrt.f32 %v1088_v32  ;;  %vm1203_vm5 = vcmp.eq.f32.partialorder %v1088_v32, inf  ;;  %v1206_v42 = vand.u32 2147483648, %v1088_v32 }
 0x241   : > { %v3884_v33 = vadd.f32 %v1085_v21, %v883_v27  ;;  %vm1205_vm6 = vcmp.eq.f32.partialorder %v1088_v32, 0.0  ;;  %vm1212_vm7 = vcmp.eq.f32.partialorder %v3877_v31, 0.0  ;;  %v1515_v21 = vld [vmem:[#allocation13 + $0x18] sm:$0xff] }
 0x242   : > { %v3887_v34 = vadd.f32 %v1084_v23, %v882_v28  ;;  %v1229_v28 = vld [vmem:[%s3667_s26] sm:$0xff]  ;;  %v2776_v22 = vpack.c.bf16 %v1515_v21, %v1513_v8 }
 0x243   : > { %2938 = vrsqrt.f32 %v3884_v33  ;;  %vm1224_vm8 = vcmp.eq.f32.partialorder %v3884_v33, inf  ;;  %v1227_v7 = vand.u32 2147483648, %v3884_v33  ;;  %vm1226_vm11 = vcmp.eq.f32.partialorder %v3884_v33, 0.0  ;;  %v1514_v23 = vld [vmem:[#allocation13 + $0x10] sm:$0xff] }
 0x244   : > { %2940 = vrsqrt.f32 %v3887_v34  ;;  %vm1217_vm9 = vcmp.eq.f32.partialorder %v3887_v34, inf  ;;  %v1220_v3 = vand.u32 2147483648, %v3887_v34  ;;  %vm1219_vm10 = vcmp.eq.f32.partialorder %v3887_v34, 0.0  ;;  %2777 = vmatprep.subr.bf16.mxu1 %v2776_v22 }
 0x245   : > { %v2931_v11 = vpop.eup %2930 }
 0x246   : > { %v2933_v35 = vpop.eup %2932  ;;  %v1195_v24 = vmul.f32 %v2931_v11, %v1087_v13  ;;  %v1519_v11 = vld [vmem:[#allocation13 + $0x38] sm:$0xff] }
 0x247   : > { %v1188_v15 = vmul.f32 %v2933_v35, %v1086_v14 }
 0x248   : > { %v1197_v46 = vsel %vm1196_vm0, %v1087_v13, %v1195_v24  ;;  %v1246_v13 = vld [vmem:[#allocation10 + $0x58] sm:$0xff]  ;;  %v1516_v24 = vld [vmem:[#allocation13 + $0x20] sm:$0xff] }
 0x249   : > { %v2935_v47 = vpop.eup %2934  ;;  %v1190_v49 = vsel %vm1189_vm1, %v1086_v14, %v1188_v15  ;;  %v1200_v55 = vsel %vm1198_vm3, %v1199_v50, %v1197_v46  ;;  %v2764_v14 = vpack.c.bf16 %v1246_v13, %v1245_v12  ;;  %v1518_v15 = vld [vmem:[#allocation13 + $0x30] sm:$0xff] }
 0x24a   : > { %v2937_v20 = vpop.eup %2936  ;;  %v1193_v52 = vsel %vm1191_vm2, %v1192_v44, %v1190_v49  ;;  %v1209_v54 = vmul.f32 %v2935_v47, %v3877_v31  ;;  %v2782_v36 = vpack.c.bf16 %v1518_v15, %v1516_v24  ;;  %v1523_v44 = vld [vmem:[#allocation13 + $0x58] sm:$0xff]  ;;  %v1520_v47 = vld [vmem:[#allocation13 + $0x40] sm:$0xff]  ;;  %v1522_v49 = vld [vmem:[#allocation13 + $0x50] sm:$0xff] }
 0x24b   : > { %2470 = vmatprep.mubr.f32.mxu0 %v1193_v52  ;;  %v1202_v56 = vmul.f32 %v2937_v20, %v1088_v32  ;;  %v2784_v46 = vpack.c.bf16 %v1523_v44, %v1521_v43  ;;  %v2786_v50 = vpack.c.bf16 %v1522_v49, %v1520_v47  ;;  %v1525_v20 = vld [vmem:[#allocation13 + $0x68] sm:$0xff]  ;;  %v1527_v52 = vld [vmem:[#allocation13 + $0x78] sm:$0xff] }
 0x24c   : > { %2471 = vmatmul.mubr.f32.vlgmr.msra.gmra.mrb[18].mxu0 %v1200_v55  ;;  %v1211_v59 = vsel %vm1210_vm4, %v3877_v31, %v1209_v54  ;;  %v1233_v31 = vld [vmem:[%s3667_s26 + $0x20] sm:$0xff] }
 0x24d   : > { %v2939_v60 = vpop.eup %2938  ;;  %2747 = vmatpush3.bf16.msra.mxu0 %v3812_v4  ;;  %v1204_v61 = vsel %vm1203_vm5, %v1088_v32, %v1202_v56  ;;  %v1214_v26 = vsel %vm1212_vm7, %v1213_v62, %v1211_v59  ;;  %v1241_v4 = vld [vmem:[#allocation10 + $0x30] sm:$0xff]  ;;  %v1234_v32 = vld [vmem:[%s3667_s26 + $0x28] sm:$0xff]  ;;  %v1524_v54 = vld [vmem:[#allocation13 + $0x60] sm:$0xff] }
 0x24e   : > { %v2941_v63 = vpop.eup %2940  ;;  %v1207_v0 = vsel %vm1205_vm6, %v1206_v42, %v1204_v61  ;;  %2749 = vmatprep.subr.bf16.mxu0 %v2748_v53  ;;  %v1223_v25 = vmul.f32 %v2939_v60, %v3884_v33  ;;  %v2756_v27 = vpack.c.bf16 %v1242_v2, %v1241_v4  ;;  %v1526_v55 = vld [vmem:[#allocation13 + $0x70] sm:$0xff]  ;;  %v2792_v42 = vpack.c.bf16 %v1531_v58, %v1529_v57  ;;  %v1528_v59 = vld [vmem:[#allocation13 + $0x80] sm:$0xff]  ;;  %v1533_v62 = vld [vmem:[#allocation13 + $0xa8] sm:$0xff] }
 0x24f   : > { %2473 = vmatprep.mubr.f32.mxu0 %v1207_v0  ;;  %v1216_v45 = vmul.f32 %v2941_v63, %v3887_v34  ;;  %v2790_v56 = vpack.c.bf16 %v1526_v55, %v1524_v54  ;;  %v1530_v60 = vld [vmem:[#allocation13 + $0x90] sm:$0xff]  ;;  %v1535_v63 = vld [vmem:[#allocation13 + $0xb8] sm:$0xff] }
 0x250   : > { %2474 = vmatmul.mubr.f32.gmra.mrb[20].mxu0 %v1214_v26  ;;  %v1225_v5 = vsel %vm1224_vm8, %v3884_v33, %v1223_v25  ;;  %v2778_v33 = vpack.c.bf16 %v1514_v23, %v1512_v41  ;;  %v2794_v61 = vpack.c.bf16 %v1530_v60, %v1528_v59  ;;  %v2796_v0 = vpack.c.bf16 %v1535_v63, %v1533_v62  ;;  %v1534_v25 = vld [vmem:[#allocation13 + $0xb0] sm:$0xff]  ;;  %v1539_v4 = vld [vmem:[#allocation13 + $0xd8] sm:$0xff]  ;;  %v1989_v41 = vld [vmem:[%s4171_s6] ss:$0 sm:$0xff] }
 0x251   : > { %2751 = vmatpush3.bf16.msra.mxu0 %v2748_v53  ;;  %v1218_v6 = vsel %vm1217_vm9, %v3887_v34, %v1216_v45  ;;  %v1228_v29 = vsel %vm1226_vm11, %v1227_v7, %v1225_v5  ;;  %v1517_v34 = vld [vmem:[#allocation13 + $0x28] sm:$0xff]  ;;  %v2788_v53 = vpack.c.bf16 %v1527_v52, %v1525_v20  ;;  %v1538_v5 = vld [vmem:[#allocation13 + $0xd0] sm:$0xff] }
 0x252   : > { %v1221_v9 = vsel %vm1219_vm10, %v1220_v3, %v1218_v6  ;;  %2753 = vmatprep.subr.bf16.mxu0 %v2752_v1  ;;  %2779 = vmatpush1.bf16.msra.mxu1 %v2778_v33  ;;  %v2780_v35 = vpack.c.bf16 %v1519_v11, %v1517_v34  ;;  %v1537_v45 = vld [vmem:[#allocation13 + $0xc8] sm:$0xff]  ;;  %v1536_v3 = vld [vmem:[#allocation13 + $0xc0] sm:$0xff] }
 0x253   : > { %2476 = vmatprep.mubr.f32.mxu0 %v1221_v9  ;;  %v2800_v2 = vpack.c.bf16 %v1539_v4, %v1537_v45  ;;  %v2802_v6 = vpack.c.bf16 %v1538_v5, %v1536_v3  ;;  %v1541_v7 = vld [vmem:[#allocation13 + $0xe8] sm:$0xff]  ;;  %v1543_v9 = vld [vmem:[#allocation13 + $0xf8] sm:$0xff] }
 0x254   : > { %2477 = vmatmul.mubr.f32.gmra.mrb[22].mxu0 %v1228_v29  ;;  %2781 = vmatprep.subr.bf16.mxu1 %v2780_v35  ;;  %v1542_v29 = vld [vmem:[#allocation13 + $0xf0] sm:$0xff] }
 0x255   : > { %2755 = vmatpush3.bf16.msra.mxu0 %v2752_v1  ;;  %2511 = vmatprep.mubr.f32.mxu0 %v1229_v28  ;;  %v1532_v1 = vld [vmem:[#allocation13 + $0xa0] sm:$0xff] }
 0x256   : > { %2757 = vmatprep.subr.bf16.mxu0 %v2756_v27  ;;  %2783 = vmatpush1.bf16.msra.mxu1 %v2782_v36  ;;  %v2798_v26 = vpack.c.bf16 %v1534_v25, %v1532_v1  ;;  %v1540_v28 = vld [vmem:[#allocation13 + $0xe0] sm:$0xff] }
 0x257   : > { %2785 = vmatprep.subr.bf16.mxu1 %v2784_v46  ;;  %v2806_v30 = vpack.c.bf16 %v1542_v29, %v1540_v28  ;;  %v1546_v29 = vlaneseq }
 0x259   : > { %2759 = vmatpush3.bf16.msra.mxu0 %v2756_v27  ;;  %v2804_v27 = vpack.c.bf16 %v1543_v9, %v1541_v7 }
 0x25a   : > { %2761 = vmatprep.subr.bf16.mxu0 %v2760_v48  ;;  %2787 = vmatpush1.bf16.msra.mxu1 %v2786_v50 }
 0x25b   : > { %2789 = vmatprep.subr.bf16.mxu1 %v2788_v53 }
 0x25d   : > { %2763 = vmatpush3.bf16.msra.mxu0 %v2760_v48  ;;  %v3928_v48 = vpop.f32.mrb[0].mxu1 }
 0x25e   : > { %2765 = vmatprep.subr.bf16.mxu0 %v2764_v14  ;;  %2791 = vmatpush1.bf16.msra.mxu1 %v2790_v56  ;;  %v3930_v12 = vpop.f32.mrb[1].mxu1 }
 0x25f   : > { %2793 = vmatprep.subr.bf16.mxu1 %v2792_v42  ;;  %v3932_v13 = vpop.f32.mrb[2].mxu1 }
 0x261   : > { %2767 = vmatpush3.bf16.msra.mxu0 %v2764_v14  ;;  %v3934_v14 = vpop.f32.mrb[3].mxu1 }
 0x262   : > { %2769 = vmatprep.subr.bf16.mxu0 %v2768_v51  ;;  %2795 = vmatpush1.bf16.msra.mxu1 %v2794_v61  ;;  %v3936_v16 = vpop.f32.mrb[4].mxu1 }
 0x263   : > { %2797 = vmatprep.subr.bf16.mxu1 %v2796_v0  ;;  %v3938_v17 = vpop.f32.mrb[5].mxu1 }
 0x265   : > { %2771 = vmatpush3.bf16.msra.mxu0 %v2768_v51 }
 0x266   : > { %2773 = vmatprep.subr.bf16.mxu0 %v2772_v38  ;;  %2799 = vmatpush1.bf16.msra.mxu1 %v2798_v26  ;;  %v3940_v51 = vpop.f32.mrb[6].mxu1 }
 0x267   : > { %2801 = vmatprep.subr.bf16.mxu1 %v2800_v2  ;;  %v3942_v18 = vpop.f32.mrb[7].mxu1 }
 0x269   : > { %2775 = vmatpush3.bf16.msra.mxu0 %v2772_v38 }
 0x26a   : > { %2803 = vmatpush1.bf16.msra.mxu1 %v2802_v6  ;;  %v3944_v37 = vpop.f32.mrb[8].mxu1 }
 0x26b   : > { %2805 = vmatprep.subr.bf16.mxu1 %v2804_v27  ;;  %v3946_v38 = vpop.f32.mrb[9].mxu1 }
 0x26c   : > { %2512 = vmatmul.mubr.f32.vlgmr.msra.gmra.mrb[18].mxu0 %v1230_v19 }
 0x26d   : > { %2514 = vmatprep.mubr.f32.mxu0 %v1231_v39 }
 0x26e   : > { %2807 = vmatpush1.bf16.msra.mxu1 %v2806_v30  ;;  %v3948_v19 = vpop.f32.mrb[10].mxu1  ;;  %v1547_v30 = vshrl.u32 %v1546_v29, 7 }
 0x26f   : > { %v3950_v39 = vpop.f32.mrb[11].mxu1 }
 0x270   : > { %2515 = vmatmul.mubr.f32.gmra.mrb[20].mxu0 %v1232_v40 }
 0x271   : > { %2517 = vmatprep.mubr.f32.mxu0 %v1233_v31 }
 0x274   : > { %2518 = vmatmul.mubr.f32.gmra.mrb[22].mxu0 %v1234_v32 }
 0x286   : > { %v3952_v40 = vpop.f32.mrb[12].mxu1 }
 0x287   : > { %v3954_v31 = vpop.f32.mrb[13].mxu1 }
 0x28a   : > { %v3956_v32 = vpop.f32.mrb[14].mxu1 }
 0x28b   : > { %v3958_v8 = vpop.f32.mrb[15].mxu1 }
 0x28e   : > { %v3960_v21 = vpop.f32.mrb[16].mxu1 }
 0x28f   : > { %v3962_v22 = vpop.f32.mrb[17].mxu1 }
 0x33f   : > { %v2513_v23 = vpop.f32.mrb[18].mxu0 }
 0x340   : > { %v1465_v33 = vadd.f32 %v2513_v23, %v1989_v41  ;;  %v1428_v34 = vpop.f32.mrb[19].mxu0  ;;  %v1544_v23 = vld [vmem:[%s4213_s29] sm:$0x3] }
 0x341   : > { %v1464_v11 = vadd.f32 %v1989_v41, %v1428_v34 }
 0x342   : > { %v1991_v35 = vmul.f32 -1.442695, %v1465_v33 }
 0x343   : > { %v1990_v24 = vmul.f32 -1.442695, %v1464_v11  ;;  %v2516_v15 = vpop.f32.mrb[20].mxu0 }
 0x344   : > { %2942 = vpow2.f32 %v1991_v35  ;;  %v1467_v36 = vadd.f32 %v2516_v15, %v1989_v41  ;;  %v1438_v43 = vpop.f32.mrb[21].mxu0 }
 0x345   : > { %2944 = vpow2.f32 %v1990_v24  ;;  %v1466_v44 = vadd.f32 %v1989_v41, %v1438_v43 }
 0x346   : > { %v1993_v46 = vmul.f32 -1.442695, %v1467_v36 }
 0x347   : > { %v1992_v47 = vmul.f32 -1.442695, %v1466_v44  ;;  %v2519_v49 = vpop.f32.mrb[22].mxu0 }
 0x348   : > { %v1448_v50 = vpop.f32.mrb[23].mxu0  ;;  %v1469_v52 = vadd.f32 %v2519_v49, %v1989_v41 }
 0x349   : > { %2946 = vpow2.f32 %v1992_v47  ;;  %v1468_v20 = vadd.f32 %v1989_v41, %v1448_v50  ;;  %v1548_v41 = vsub.s32 0, %v1547_v30 }
 0x34a   : > { %2948 = vpow2.f32 %v1993_v46  ;;  %v1995_v56 = vmul.f32 -1.442695, %v1469_v52 }
 0x34b   : > { %v1994_v53 = vmul.f32 -1.442695, %v1468_v20  ;;  %v3975_v34 = vrot.slane %v1544_v23, %v1548_v41 }
 0x34d   : > { %2950 = vpow2.f32 %v1994_v53 }
 0x34e   : > { %v2943_v54 = vpop.eup %2942 }
 0x34f   : > { %v2945_v55 = vpop.eup %2944  ;;  %v1489_v57 = vadd.f32 1.0, %v2943_v54 }
 0x350   : > { %v1488_v58 = vadd.f32 1.0, %v2945_v55 }
 0x352   : > { %2952 = vrcp.f32 %v1488_v58 }
 0x353   : > { %v2947_v42 = vpop.eup %2946  ;;  %2954 = vpow2.f32 %v1995_v56 }
 0x354   : > { %2956 = vrcp.f32 %v1489_v57  ;;  %v1490_v59 = vadd.f32 1.0, %v2947_v42  ;;  %v2949_v60 = vpop.eup %2948 }
 0x355   : > { %v1491_v61 = vadd.f32 1.0, %v2949_v60 }
 0x356   : > { %2958 = vrcp.f32 %v1490_v59 }
 0x357   : > { %v2951_v62 = vpop.eup %2950  ;;  %2960 = vrcp.f32 %v1491_v61 }
 0x358   : > { %v1492_v0 = vadd.f32 1.0, %v2951_v62 }
 0x35a   : > { %2962 = vrcp.f32 %v1492_v0 }
 0x35c   : > { %v2953_v63 = vpop.eup %2952 }
 0x35d   : > { %v2955_v1 = vpop.eup %2954  ;;  %v1506_v25 = vmul.f32 %v2953_v63, %v1464_v11 }
 0x35e   : > { %v2957_v26 = vpop.eup %2956  ;;  %v1493_v45 = vadd.f32 1.0, %v2955_v1 }
 0x35f   : > { %1621 = vmatmul.mubr.f32.vlgmr.msra.gmra.mrb[18].mxu1 %v1506_v25  ;;  %v1507_v4 = vmul.f32 %v2957_v26, %v1465_v33  ;;  %v1552_v33 = vsub.s32 1, %v1547_v30 }
 0x360   : > { %1626 = vmatprep.mubr.f32.mxu1 %v3317_v10  ;;  %v2959_v2 = vpop.eup %2958  ;;  %2964 = vrcp.f32 %v1493_v45 }
 0x361   : > { %v1508_v3 = vmul.f32 %v2959_v2, %v1466_v44  ;;  %v2961_v5 = vpop.eup %2960  ;;  %v3977_v11 = vrot.slane %v1544_v23, %v1552_v33 }
 0x362   : > { %v1509_v6 = vmul.f32 %v2961_v5, %v1467_v36 }
 0x363   : > { %1627 = vmatmul.mubr.f32.gmra.mrb[20].mxu1 %v1507_v4 }
 0x364   : > { %1632 = vmatprep.mubr.f32.mxu1 %v3317_v10  ;;  %v2963_v7 = vpop.eup %2962 }
 0x365   : > { %v1510_v9 = vmul.f32 %v2963_v7, %v1468_v20 }
 0x367   : > { %1633 = vmatmul.mubr.f32.gmra.mrb[22].mxu1 %v1508_v3 }
 0x368   : > { %1638 = vmatprep.mubr.f32.mxu1 %v3317_v10 }
 0x36a   : > { %v2965_v27 = vpop.eup %2964 }
 0x36b   : > { %1639 = vmatmul.mubr.f32.gmra.mrb[24].mxu1 %v1509_v6  ;;  %v1511_v28 = vmul.f32 %v2965_v27, %v1469_v52 }
 0x36c   : > { %1644 = vmatprep.mubr.f32.mxu1 %v3317_v10 }
 0x36f   : > { %1645 = vmatmul.mubr.f32.gmra.mrb[26].mxu1 %v1510_v9 }
 0x370   : > { %1650 = vmatprep.mubr.f32.mxu1 %v3317_v10 }
 0x373   : > { %1651 = vmatmul.mubr.f32.gmra.mrb[28].mxu1 %v1511_v28 }
 0x432   : > { %v1622_v35 = vpop.f32.mrb[18].mxu1 }
 0x433   : > { %v3980_v24 = vadd.f32 %v1622_v35, %v3975_v34  ;;  %v1624_v10 = vpop.f32.mrb[19].mxu1 }
 0x434   : > { %v1625_v15 = vadd.f32 %v1624_v10, %v3977_v11 }
 0x435   : > { %v1996_v36 = vmul.f32 -1.442695, %v3980_v24 }
 0x436   : > { %v1705_v43 = vmul.f32 %v1625_v15, %v3930_v12  ;;  %v1717_v44 = vmul.f32 %v1625_v15, %v3942_v18  ;;  %v1729_v46 = vmul.f32 %v1625_v15, %v3954_v31  ;;  %v1628_v47 = vpop.f32.mrb[20].mxu1 }
 0x437   : > { %2966 = vpow2.f32 %v1996_v36  ;;  %v3988_v49 = vadd.f32 %v1628_v47, %v3975_v34  ;;  %v1630_v50 = vpop.f32.mrb[21].mxu1 }
 0x438   : > { %1711 = vst [vmem:[%s3992_s22] sm:$0xff] %v1705_v43  ;;  %1723 = vst [vmem:[%s3992_s22 + $0x8] sm:$0xff] %v1717_v44  ;;  %v1631_v12 = vadd.f32 %v1630_v50, %v3977_v11 }
 0x439   : > { %1735 = vst [vmem:[%s3992_s22 + $0x10] sm:$0xff] %v1729_v46  ;;  %v1997_v18 = vmul.f32 -1.442695, %v3988_v49 }
 0x43a   : > { %v1706_v31 = vmul.f32 %v3928_v48, %v1631_v12  ;;  %v1718_v20 = vmul.f32 %v3940_v51, %v1631_v12  ;;  %v1730_v52 = vmul.f32 %v3952_v40, %v1631_v12  ;;  %v1634_v53 = vpop.f32.mrb[22].mxu1 }
 0x43b   : > { %2968 = vpow2.f32 %v1997_v18  ;;  %v4003_v54 = vadd.f32 %v1634_v53, %v3975_v34  ;;  %v1636_v55 = vpop.f32.mrb[23].mxu1 }
 0x43c   : > { %1712 = vst [vmem:[%s3992_s22 + $0x18] sm:$0xff] %v1706_v31  ;;  %1724 = vst [vmem:[%s3992_s22 + $0x20] sm:$0xff] %v1718_v20  ;;  %v1637_v56 = vadd.f32 %v1636_v55, %v3977_v11 }
 0x43d   : > { %1736 = vst [vmem:[%s3992_s22 + $0x28] sm:$0xff] %v1730_v52  ;;  %v1998_v48 = vmul.f32 -1.442695, %v4003_v54 }
 0x43e   : > { %v1707_v51 = vmul.f32 %v1637_v56, %v3934_v14  ;;  %v1719_v40 = vmul.f32 %v1637_v56, %v3946_v38  ;;  %v1731_v57 = vmul.f32 %v1637_v56, %v3958_v8  ;;  %v1640_v58 = vpop.f32.mrb[24].mxu1 }
 0x43f   : > { %2970 = vpow2.f32 %v1998_v48  ;;  %v4014_v42 = vadd.f32 %v1640_v58, %v3975_v34  ;;  %v1642_v59 = vpop.f32.mrb[25].mxu1 }
 0x440   : > { %1713 = vst [vmem:[%s3992_s22 + $0x30] sm:$0xff] %v1707_v51  ;;  %1725 = vst [vmem:[%s3992_s22 + $0x38] sm:$0xff] %v1719_v40  ;;  %v1643_v60 = vadd.f32 %v1642_v59, %v3977_v11 }
 0x441   : > { %1737 = vst [vmem:[%s3992_s22 + $0x40] sm:$0xff] %v1731_v57  ;;  %v2967_v61 = vpop.eup %2966  ;;  %v1999_v14 = vmul.f32 -1.442695, %v4014_v42 }
 0x442   : > { %v1675_v38 = vadd.f32 1.0, %v2967_v61  ;;  %v1708_v8 = vmul.f32 %v3932_v13, %v1643_v60  ;;  %v1720_v62 = vmul.f32 %v3944_v37, %v1643_v60  ;;  %v1732_v63 = vmul.f32 %v3956_v32, %v1643_v60  ;;  %v1646_v0 = vpop.f32.mrb[26].mxu1 }
 0x443   : > { %2972 = vpow2.f32 %v1999_v14  ;;  %v1647_v1 = vadd.f32 %v1646_v0, %v3975_v34  ;;  %v1648_v25 = vpop.f32.mrb[27].mxu1 }
 0x444   : > { %2974 = vrcp.f32 %v1675_v38  ;;  %1714 = vst [vmem:[%s3992_s22 + $0x48] sm:$0xff] %v1708_v8  ;;  %1726 = vst [vmem:[%s3992_s22 + $0x50] sm:$0xff] %v1720_v62  ;;  %v1649_v26 = vadd.f32 %v1648_v25, %v3977_v11 }
 0x445   : > { %1738 = vst [vmem:[%s3992_s22 + $0x58] sm:$0xff] %v1732_v63  ;;  %v2969_v45 = vpop.eup %2968  ;;  %v2000_v13 = vmul.f32 -1.442695, %v1647_v1 }
 0x446   : > { %v1676_v4 = vadd.f32 1.0, %v2969_v45  ;;  %v1709_v37 = vmul.f32 %v1649_v26, %v3938_v17  ;;  %v1721_v32 = vmul.f32 %v1649_v26, %v3950_v39  ;;  %v1733_v2 = vmul.f32 %v1649_v26, %v3962_v22  ;;  %v1652_v3 = vpop.f32.mrb[28].mxu1 }
 0x447   : > { %2976 = vpow2.f32 %v2000_v13  ;;  %v1653_v5 = vadd.f32 %v1652_v3, %v3975_v34  ;;  %v1654_v6 = vpop.f32.mrb[29].mxu1 }
 0x448   : > { %2978 = vrcp.f32 %v1676_v4  ;;  %1715 = vst [vmem:[%s3992_s22 + $0x60] sm:$0xff] %v1709_v37  ;;  %1727 = vst [vmem:[%s3992_s22 + $0x68] sm:$0xff] %v1721_v32  ;;  %v1655_v7 = vadd.f32 %v1654_v6, %v3977_v11 }
 0x449   : > { %1739 = vst [vmem:[%s3992_s22 + $0x70] sm:$0xff] %v1733_v2  ;;  %v2971_v9 = vpop.eup %2970  ;;  %v2001_v17 = vmul.f32 -1.442695, %v1653_v5 }
 0x44a   : > { %v1677_v39 = vadd.f32 1.0, %v2971_v9  ;;  %v1710_v22 = vmul.f32 %v3936_v16, %v1655_v7  ;;  %v1722_v27 = vmul.f32 %v3948_v19, %v1655_v7  ;;  %v1734_v28 = vmul.f32 %v3960_v21, %v1655_v7 }
 0x44b   : > { %2980 = vpow2.f32 %v2001_v17 }
 0x44c   : > { %2982 = vrcp.f32 %v1677_v39  ;;  %1716 = vst [vmem:[%s3992_s22 + $0x78] sm:$0xff] %v1710_v22  ;;  %1728 = vst [vmem:[%s3992_s22 + $0x80] sm:$0xff] %v1722_v27 }
 0x44d   : > { %1740 = vst [vmem:[%s3992_s22 + $0x88] sm:$0xff] %v1734_v28  ;;  %v2973_v29 = vpop.eup %2972 }
 0x44e   : > { %v2975_v30 = vpop.eup %2974  ;;  %v1678_v41 = vadd.f32 1.0, %v2973_v29 }
 0x44f   : > { %v1693_v23 = vmul.f32 %v2975_v30, %v3980_v24 }
 0x450   : > { %2984 = vrcp.f32 %v1678_v41 }
 0x451   : > { %v2977_v33 = vpop.eup %2976  ;;  %1699 = vst [vmem:[%s4046_s20] sm:$0xff] %v1693_v23 }
 0x452   : > { %v2979_v16 = vpop.eup %2978  ;;  %v1679_v19 = vadd.f32 1.0, %v2977_v33 }
 0x453   : > { %v1694_v21 = vmul.f32 %v2979_v16, %v3988_v49 }
 0x454   : > { %2986 = vrcp.f32 %v1679_v19 }
 0x455   : > { %v2981_v34 = vpop.eup %2980  ;;  %1700 = vst [vmem:[%s4046_s20 + $0x8] sm:$0xff] %v1694_v21 }
 0x456   : > { %v2983_v11 = vpop.eup %2982  ;;  %v1680_v35 = vadd.f32 1.0, %v2981_v34 }
 0x457   : > { %v1695_v24 = vmul.f32 %v2983_v11, %v4003_v54 }
 0x458   : > { %2988 = vrcp.f32 %v1680_v35 }
 0x459   : > { %1701 = vst [vmem:[%s4046_s20 + $0x10] sm:$0xff] %v1695_v24 }
 0x45a   : > { %v2985_v10 = vpop.eup %2984 }
 0x45b   : > { %v1696_v15 = vmul.f32 %v2985_v10, %v4014_v42 }
 0x45d   : > { %1702 = vst [vmem:[%s4046_s20 + $0x18] sm:$0xff] %v1696_v15 }
 0x45e   : > { %v2987_v36 = vpop.eup %2986 }
 0x45f   : > { %v1697_v43 = vmul.f32 %v2987_v36, %v1647_v1  ;;  %1753 = sbr.rel (!%p4215_p7) target bundleno = 1155 (0x483), region = 88 }
 0x461   : > { %1703 = vst [vmem:[%s4046_s20 + $0x20] sm:$0xff] %v1697_v43 }
 0x462   : > { %v2989_v44 = vpop.eup %2988 }
 0x463   : > { %v1698_v46 = vmul.f32 %v2989_v44, %v1653_v5 }
 0x465   : > { %1704 = vst [vmem:[%s4046_s20 + $0x28] sm:$0xff] %v1698_v46 }
 0x466   : > { %s4234_s23 = smov (!%p1756_p8, %s1755_s23), 6 }
 0x467   : > { %s4062_s19 = sshll.u32 %s4234_s23, 7 }
 0x468   : > { %s1760_s8 = ssub.s32 768, %s4062_s19 }
 0x469   : > { %1761 = vsyncadd %s1742_s9, %s1760_s8  ;;  %p2003_p9 = scmp.ne.s32.totalorder %s4062_s19, 0  ;;  %s2015_s26 = smul.u32 768, %s3400_s17 }
 0x46a   : > { %s1766_s27 = sshll.u32 %s4046_s20, 4  ;;  %s4216_s13 = sld [smem:[#allocation31_spill]]  ;;  %s4075_s27 = int_to_ptr.vmem [resolvable:$true] %s1766_s27 }
 0x46b   : > { %s3186_s21 = scalar_lea.vmem %s4075_s27, %s4062_s19  ;;  %s3318_s18 = smov [#allocation14]  }
 0x46c   : > { %p3187_p1 = scmp.ne.s32.totalorder %s4075_s27, %s3186_s21  ;;  %s3190_s29 = sshll.u32 %s3318_s18, 4  ;;  %s3191_s29 = int_to_ptr.vmem [resolvable:$false] %s3190_s29 }
 0x46d   : > { %s3192_s12 = scalar_lea.vmem %s3191_s29, 1536  ;;  %p3193_p5 = scmp.lt.s32.totalorder %s4075_s27, %s3191_s29 }
 0x46e   : > { %p3188_p3 = pnand %p3187_p1, %p2003_p9  ;;  %p3194_p2 = scmp.lt.s32.totalorder %s3192_s12, %s3186_s21 }
 0x470   : > { %s4217_s24 = smov %s4216_s13  ;;  %s4073_s10 = scalar_lea.hbm %s4216_s13, %s2015_s26 }
 0x471   : > { %p3189_p10 = pneg %p3188_p3  ;;  %p3195_p6 = por %p3194_p2, %p3193_p5 }
 0x473   : > { %p3196_p11 = pnand %p3195_p6, %p3189_p10 }
 0x475   : > { %3199 = shalt.err (!%p3196_p11)
}
 0x476   : > { %s3200_s20 = scalar_lea.hbm %s4073_s10, %s4062_s19  ;;  %s3204_s8 = scalar_lea.hbm %s4217_s24, 1152 }
 0x477   : > { %p3201_p13 = scmp.ne.s32.totalorder %s4073_s10, %s3200_s20  ;;  %p3205_p7 = scmp.lt.u32.totalorder %s4073_s10, %s4217_s24 }
 0x478   : > { %p3206_p8 = scmp.lt.u32.totalorder %s3204_s8, %s3200_s20  ;;  %p3208_p3 = scmp.lt.u32.totalorder %s3200_s20, %s4073_s10 }
 0x479   : > { %p3202_p0 = pnand %p3201_p13, %p2003_p9 }
 0x47a   : > { %p3207_p1 = por %p3206_p8, %p3205_p7 }
 0x47b   : > { %p3203_p12 = pneg %p3202_p0 }
 0x47c   : > { %p3209_p10 = por %p3208_p3, %p3207_p1 }
 0x47e   : > { %p3210_p5 = pnand %p3209_p10, %p3203_p12 }
 0x480   : > { %3213 = shalt.err (!%p3210_p5)
}
 0x481   : > { %s3319_s3 = smov 128   ;;  %s3320_s13 = smov 8  }
 0x482   : > { %1772 = dma.vmem_to_hbm [thread:$0]  (%p2003_p9), %s4075_s27, %s4062_s19, %s4073_s10, %s1742_s9, %s3319_s3, %s3319_s3, %s3320_s13  }
 0x483 PF: > { %s4218_s21 = sld [smem:[#allocation27_spill]] }
 0x489   : > { %p4219_p2 = scmp.ne.s32.totalorder %s4218_s21, 0 }
 0x48a   : > { %s1776_s18 = smul.u32 (%p4219_p2), 6, %s3400_s17 }
 0x48b   : > { %1775 = sbr.rel (!%p4219_p2) target bundleno = 1200 (0x4b0), region = 92 }
 0x48c   : > { %s1777_s29 = ssub.s32 (%p4219_p2), 9, %s1776_s18 }
 0x48d   : > { %p1778_p6 = scmp.lt.s32.totalorder (%p4219_p2), %s1777_s29, 6 }
 0x492   : > { %s4236_s29 = smov (!%p1778_p6, %s1777_s29), 6 }
 0x493   : > { %s4106_s12 = smul.u32 384, %s4236_s29 }
 0x495   : > { %s1783_s20 = ssub.s32 2304, %s4106_s12 }
 0x496   : > { %1784 = vsyncadd %s1747_s25, %s1783_s20  ;;  %p2009_p9 = scmp.ne.s32.totalorder %s4106_s12, 0  ;;  %s2878_s9 = smul.u32 2304, %s3400_s17 }
 0x497   : > { %s1790_s19 = sshll.u32 %s3992_s22, 4  ;;  %s4220_s30 = sld [smem:[#allocation32_spill]]  ;;  %s4119_s19 = int_to_ptr.vmem [resolvable:$true] %s1790_s19 }
 0x498   : > { %s3214_s8 = scalar_lea.vmem %s4119_s19, %s4106_s12  ;;  %s3321_s26 = smov [#allocation15]  }
 0x499   : > { %p3215_p11 = scmp.ne.s32.totalorder %s4119_s19, %s3214_s8  ;;  %s3218_s28 = sshll.u32 %s3321_s26, 4  ;;  %s3219_s28 = int_to_ptr.vmem [resolvable:$false] %s3218_s28 }
 0x49a   : > { %s3220_s17 = scalar_lea.vmem %s3219_s28, 4608  ;;  %p3221_p12 = scmp.lt.s32.totalorder %s4119_s19, %s3219_s28 }
 0x49b   : > { %p3216_p13 = pnand %p3215_p11, %p2009_p9  ;;  %p3222_p7 = scmp.lt.s32.totalorder %s3220_s17, %s3214_s8 }
 0x49d   : > { %s4117_s23 = scalar_lea.hbm %s4220_s30, %s2878_s9  ;;  %p3217_p0 = pneg %p3216_p13 }
 0x49e   : > { %p3223_p8 = por %p3222_p7, %p3221_p12 }
 0x4a0   : > { %p3224_p1 = pnand %p3223_p8, %p3217_p0 }
 0x4a2   : > { %3227 = shalt.err (!%p3224_p1)
}
 0x4a3   : > { %s3228_s22 = scalar_lea.hbm %s4117_s23, %s4106_s12  ;;  %s3232_s21 = scalar_lea.hbm %s4220_s30, 3456 }
 0x4a4   : > { %p3229_p3 = scmp.ne.s32.totalorder %s4117_s23, %s3228_s22  ;;  %p3233_p2 = scmp.lt.u32.totalorder %s4117_s23, %s4220_s30 }
 0x4a5   : > { %p3234_p6 = scmp.lt.u32.totalorder %s3232_s21, %s3228_s22  ;;  %p3236_p13 = scmp.lt.u32.totalorder %s3228_s22, %s4117_s23 }
 0x4a6   : > { %p3230_p10 = pnand %p3229_p3, %p2009_p9 }
 0x4a7   : > { %p3235_p11 = por %p3234_p6, %p3233_p2 }
 0x4a8   : > { %p3231_p5 = pneg %p3230_p10 }
 0x4a9   : > { %p3237_p0 = por %p3236_p13, %p3235_p11 }
 0x4ab   : > { %p3238_p12 = pnand %p3237_p0, %p3231_p5 }
 0x4ad   : > { %3241 = shalt.err (!%p3238_p12)
}
 0x4ae   : > { %s3322_s20 = smov 384   ;;  %s3323_s9 = smov 24  }
 0x4af   : > { %1796 = dma.vmem_to_hbm [thread:$0]  (%p2009_p9), %s4119_s19, %s4106_s12, %s4117_s23, %s1747_s25, %s3322_s20, %s3322_s20, %s3323_s9  }
 0x4b0 PF: > { %s4221_s27 = sld [smem:[#allocation24_spill]]  ;;  %s4222_s10 = sld [smem:[#allocation28_spill]] }
 0x4b6   : > { %s1805_s8 = sand.u32 1, %s4221_s27   ;;  %p4223_p7 = scmp.ne.s32.totalorder %s4222_s10, 0 }
 0x4b7   : > { %s1806_s26 = scalar_lea.sflag [#allocation4], %s1805_s8 }
 0x4b8   : > { %p2861_p8 = pnand %p1972_p4, %p4223_p7 }
 0x4ba   : > { %3279 = dma.done.wait (!%p2861_p8), %s1806_s26, 768  }
 0x4bb   : > { %3281 = vsyncadd (!%p2861_p8), %s1806_s26, 4294966528  ;;  %s1815_s28 = scalar_lea.sflag [#allocation16], %s1805_s8 }
 0x4bc   : > { %3283 = dma.done.wait (!%p2861_p8), %s1815_s28, 2304  }
 0x4bd   : > { %3285 = vsyncadd (!%p2861_p8), %s1815_s28, 4294964992  ;;  %s4224_s16 = sld [smem:[#allocation25_spill]]  ;;  %s4225_s11 = sld [smem:[#allocation26_spill]] }
 0x4be   : > { %s4226_s13 = smov %s3292_s14  ;;  %s4227_s14 = smov %s3296_s15 }
 0x4c3   : > { %p32_p9 = scmp.ge.s32.totalorder %s4224_s16, 4   ;;  %s4228_s15 = smov %s4225_s11 }
 0x4c5   :  { %34 = sbr.rel (!%p32_p9) target bundleno = 16 (0x10), region = 151 }
 0x4cc   :  { %1820 = vsyncpa [#allocation3], 1 }
 0x4cd   :  { %1822 = vsyncpa [#allocation3 + $0x1], 1 }
 0x4ce   :  { %1823 = vsyncpa [#allocation6], 1 }
 0x4cf   :  { %1825 = vsyncpa [#allocation6 + $0x1], 1 }
 0x4d0   :  { %1826 = vsyncpa [#allocation9], 1 }
 0x4d1   :  { %1827 = vsyncpa [#allocation12], 1 }
 0x4d2   :  { %1828 = vsyncpa [#allocation4], 1 }
 0x4d3   :  { %1830 = vsyncpa [#allocation4 + $0x1], 1 }
 0x4d4   :  { %1831 = vsyncpa [#allocation16], 1 }
 0x4d5   :  { %1833 = vsyncpa [#allocation16 + $0x1], 1 }

</bundles_post_ra>
